<compile_context>
chip_gen: v7x
topology: tpu7x:2x2x1
jax: 0.10.0
libtpu: 0.0.40
codegen_flags: <defaults>
</compile_context>

<pallas_src>
import functools

import jax
import jax.numpy as jnp
from jax import lax
from jax.experimental import pallas as pl
from jax.experimental.pallas import tpu as pltpu

NUM_LAYERS = 2


def bgnn_kernel(src_ref, dst_ref, h_nodes_ref,
                wn_ref, bn_ref, wa_ref, ba_ref, attn_ref,
                nodes_out_ref, attrs_out_ref,
                c_acc_ref,
                *, compute_dtype, approx_recip, num_layers):
    cdt = compute_dtype
    step = pl.program_id(0)
    N, H = h_nodes_ref.shape
    A = attrs_out_ref.shape[0]
    E_TILE = src_ref.shape[1]

    # ---------------- per-step: accumulate the count adjacency C ----------------
    @pl.when(step == 0)
    def _():
        c_acc_ref[...] = jnp.zeros_like(c_acc_ref)

    src_row = src_ref[...]                                   # [1, E_TILE] int32 (lane-dense)
    dst_row = dst_ref[...]                                   # [1, E_TILE] int32
    iota_n = lax.broadcasted_iota(jnp.int32, (N, E_TILE), 0)
    iota_a = lax.broadcasted_iota(jnp.int32, (A, E_TILE), 0)
    # Padded edges carry index -1 and match nothing -> zero contribution.
    src_oh = (src_row == iota_n).astype(cdt)                 # [N, E_TILE]
    dst_oh = (dst_row == iota_a).astype(cdt)                 # [A, E_TILE]
    # C_partial = src_oh @ dst_oh^T  (contract lane axis on both; canonical nt feed)
    c_acc_ref[...] += lax.dot_general(
        src_oh, dst_oh, (((1,), (1,)), ((), ())),
        preferred_element_type=jnp.float32)                  # [N, A] exact f32 counts

    # ---------------- last step: run all layers on the collapsed graph ----------
    @pl.when(step == pl.num_programs(0) - 1)
    def _():
        C = c_acc_ref[...]                                   # [N, A] f32 (exact)
        deg = jnp.sum(C, axis=1, keepdims=True)              # [N, 1] out-degree
        Cc = C.astype(cdt)                                   # cast once, reused per layer
        CcT = jnp.transpose(C).astype(cdt)                   # [A, N], one transpose per call

        attn = attn_ref[...]                                 # [1, H] f32
        h_nodes = h_nodes_ref[...]                            # [N, H] f32 residual carrier
        h_attrs = jnp.zeros((A, H), jnp.float32)

        for layer in range(num_layers):                      # static unroll
            wn = wn_ref[layer]                               # [H, H] cdt (pre-cast in wrapper)
            wa = wa_ref[layer]
            bn = bn_ref[layer]                               # [1, H] f32
            ba = ba_ref[layer]

            # node_msg = relu(Linear(h_nodes))
            node_msg = jnp.maximum(
                jnp.dot(h_nodes.astype(cdt), wn,
                        preferred_element_type=jnp.float32) + bn, 0.0)   # [N, H] f32

            # per-node attention score via VPU mul + lane reduce (no 1-wide MXU dot)
            s = jnp.sum(node_msg * attn, axis=1, keepdims=True)          # [N, 1] f32
            m = jnp.max(jnp.where(deg > 0.0, s, -jnp.inf), keepdims=True)
            m = jnp.where(m > -jnp.inf, m, 0.0)                          # empty-graph guard
            p = jnp.exp(s - m)                                           # [N, 1]
            Z = jnp.sum(deg * p, keepdims=True)                          # [1, 1]
            inv_Z = jnp.where(Z > 0.0,
                              pl.reciprocal(Z, approx=approx_recip), 0.0)
            row_scale = p * inv_Z                                        # [N, 1] = exp(s)/Z

            # attr_msg = scatter_add(node_msg[src]*ew, dst) == C^T @ (row_scale*node_msg)
            scaled_msg = (node_msg * row_scale).astype(cdt)              # cast once
            attr_msg = jnp.dot(CcT, scaled_msg,
                               preferred_element_type=jnp.float32)       # [A, H] f32

            # h_attrs = relu(Linear(attr_msg))
            h_attrs = jnp.maximum(
                jnp.dot(attr_msg.astype(cdt), wa,
                        preferred_element_type=jnp.float32) + ba, 0.0)   # [A, H] f32

            # node update = scatter_add(h_attrs[dst]*ew, src) == row_scale * (C @ h_attrs)
            node_agg = jnp.dot(Cc, h_attrs.astype(cdt),
                               preferred_element_type=jnp.float32)       # [N, H] f32
            h_nodes = h_nodes + node_agg * row_scale

        nodes_out_ref[...] = h_nodes
        attrs_out_ref[...] = h_attrs


def init_params(key, node_dim, attr_dim, hidden_dim, num_layers=NUM_LAYERS):
    assert node_dim == hidden_dim and attr_dim == hidden_dim, \
        "BGNN only type-checks when node_dim == attr_dim == hidden_dim"
    wn, bn, wa, ba = [], [], [], []
    for i in range(num_layers):
        in_n = node_dim if i == 0 else hidden_dim
        in_a = attr_dim if i == 0 else hidden_dim
        key, k1, k2, k3, k4 = jax.random.split(key, 5)
        bd_n = 1.0 / jnp.sqrt(in_n).astype(jnp.float32)
        bd_a = 1.0 / jnp.sqrt(in_a).astype(jnp.float32)
        # PyTorch Linear stores W as [out, in]; pre-transpose to [in, out].
        Wn = jax.random.uniform(k1, (hidden_dim, in_n), jnp.float32, -bd_n, bd_n)
        Bn = jax.random.uniform(k2, (hidden_dim,), jnp.float32, -bd_n, bd_n)
        Wa = jax.random.uniform(k3, (hidden_dim, in_a), jnp.float32, -bd_a, bd_a)
        Ba = jax.random.uniform(k4, (hidden_dim,), jnp.float32, -bd_a, bd_a)
        wn.append(Wn.T)
        bn.append(Bn[None, :])
        wa.append(Wa.T)
        ba.append(Ba[None, :])
    return {
        "wn": jnp.stack(wn), "bn": jnp.stack(bn),
        "wa": jnp.stack(wa), "ba": jnp.stack(ba),
        "attn": jnp.ones((1, hidden_dim), jnp.float32),   # edge_attention
    }


def bgnn_forward(node_feats, attr_feats, edge_index, params, *, fast=True, e_tile=512):
    N, H = node_feats.shape
    A = attr_feats.shape[0]
    E = edge_index.shape[1]
    L = params["wn"].shape[0]
    compute_dtype = jnp.bfloat16 if fast else jnp.float32
    csize = 2 if fast else 4

    # E tile: multiple of 128 (lane-dense index blocks).  Edges are padded with -1
    # sentinels (match nothing in the one-hot compares -> zero contribution to C).
    e_tile = max(128, (min(e_tile, 4096) // 128) * 128)
    num_e_tiles = max(1, (E + e_tile - 1) // e_tile)
    E_pad = num_e_tiles * e_tile
    src = edge_index[0].astype(jnp.int32)
    dst = edge_index[1].astype(jnp.int32)
    if E_pad != E:
        pad = jnp.full((E_pad - E,), -1, jnp.int32)
        src = jnp.concatenate([src, pad])
        dst = jnp.concatenate([dst, pad])
    src_row = src.reshape(1, E_pad)                      # lane-dense [1, E_pad]
    dst_row = dst.reshape(1, E_pad)

    # Pre-cast the big weights in the wrapper (halves weight DMA on the fast path);
    # biases / attention stay f32 (used in f32 elementwise math).
    wn = params["wn"].astype(compute_dtype)
    wa = params["wa"].astype(compute_dtype)

    kernel = functools.partial(bgnn_kernel,
                               compute_dtype=compute_dtype,
                               approx_recip=fast,
                               num_layers=L)

    flops = (2 * E_pad * (N + A)                          # one-hot compares
             + 2 * E_pad * N * A                          # C accumulation matmuls
             + L * (2 * N * H * H + 2 * A * H * H         # the two Linears
                    + 4 * N * A * H                       # C^T@msg, C@h_attrs
                    + 4 * N * H + 2 * N * A))             # scores + scalings
    bytes_accessed = (4 * (2 * N * H + A * H)             # node in/out + attrs out
                      + 4 * 2 * E_pad                     # int32 indices
                      + csize * 2 * L * H * H             # weights
                      + 4 * (2 * L * H + H))              # biases + attention

    # Explicit VMEM budget (review): double-buffered index blocks + one-hots +
    # resident C / weights / residuals, with 2x margin, capped at v7x physical 64 MiB.
    est_vmem = (2 * 2 * 8 * e_tile * 4                    # src/dst blocks (x2 buffers, 8 sublanes)
                + csize * (N + A) * e_tile                # one-hot intermediates
                + 4 * N * A                               # C scratch
                + 2 * csize * L * H * H + 4 * 2 * L * 8 * H + 4 * 8 * H
                + 4 * (3 * N * H + 3 * A * H + 2 * N * A))
    vmem_limit = int(min(64 * 2 ** 20, max(16 * 2 ** 20, 2 * est_vmem)))

    nodes_out, attrs_out = pl.pallas_call(
        kernel,
        out_shape=(jax.ShapeDtypeStruct((N, H), jnp.float32),
                   jax.ShapeDtypeStruct((A, H), jnp.float32)),
        grid=(num_e_tiles,),
        in_specs=[
            pl.BlockSpec((1, e_tile), lambda e: (0, e)),       # src indices (lane-dense)
            pl.BlockSpec((1, e_tile), lambda e: (0, e)),       # dst indices (lane-dense)
            pl.BlockSpec((N, H), lambda e: (0, 0)),            # node features (resident)
            pl.BlockSpec((L, H, H), lambda e: (0, 0, 0)),      # wn
            pl.BlockSpec((L, 1, H), lambda e: (0, 0, 0)),      # bn
            pl.BlockSpec((L, H, H), lambda e: (0, 0, 0)),      # wa
            pl.BlockSpec((L, 1, H), lambda e: (0, 0, 0)),      # ba
            pl.BlockSpec((1, H), lambda e: (0, 0)),            # edge_attention
        ],
        out_specs=(pl.BlockSpec((N, H), lambda e: (0, 0)),
                   pl.BlockSpec((A, H), lambda e: (0, 0))),
        scratch_shapes=[pltpu.VMEM((N, A), jnp.float32)],       # C accumulator
        compiler_params=pltpu.CompilerParams(
            dimension_semantics=("arbitrary",),
            vmem_limit_bytes=vmem_limit),
        cost_estimate=pl.CostEstimate(flops=int(flops),
                                      transcendentals=int(L * N),
                                      bytes_accessed=int(bytes_accessed)),
    )(src_row, dst_row, node_feats, wn, params["bn"], wa, params["ba"], params["attn"])
    return nodes_out, attrs_out


def bgnn_reference(node_feats, attr_feats, edge_index, params):
    # Pure-JAX reference using real gather / scatter_add (semantic ground truth).
    h_nodes, h_attrs = node_feats, attr_feats
    src, dst = edge_index[0], edge_index[1]
    N, A = node_feats.shape[0], attr_feats.shape[0]
    for layer in range(params["wn"].shape[0]):
        node_msg = jax.nn.relu(h_nodes @ params["wn"][layer] + params["bn"][layer][0])
        g = node_msg[src]
        ew = jax.nn.softmax(jnp.sum(g * params["attn"][0], axis=1), axis=0)
        attr_msg = jnp.zeros((A, node_msg.shape[1]), jnp.float32).at[dst].add(g * ew[:, None])
        h_attrs = jax.nn.relu(attr_msg @ params["wa"][layer] + params["ba"][layer][0])
        ag = h_attrs[dst]
        node_agg = jnp.zeros((N, h_attrs.shape[1]), jnp.float32).at[src].add(ag * ew[:, None])
        h_nodes = h_nodes + node_agg
    return h_nodes, h_attrs


if __name__ == "__main__":
    # Lane-dense hidden axis: H = 128.  Module requires node_dim == attr_dim == hidden_dim.
    N, A, E, H = 64, 32, 256, 128

    key = jax.random.PRNGKey(0)
    k_node, k_attr, k_src, k_dst, k_param = jax.random.split(key, 5)
    node_feats = jax.random.normal(k_node, (N, H), jnp.float32)
    attr_feats = jax.random.normal(k_attr, (A, H), jnp.float32)
    edge_index = jnp.stack([
        jax.random.randint(k_src, (E,), 0, N, dtype=jnp.int32),
        jax.random.randint(k_dst, (E,), 0, A, dtype=jnp.int32),
    ])                                   # [2, E]

    params = init_params(k_param, H, H, H)

    ref_nodes, ref_attrs = bgnn_reference(node_feats, attr_feats, edge_index, params)

    # Fast path: bf16 MXU operands, f32 accumulation/elementwise, approx reciprocal.
    # e_tile=128 exercises the multi-step E-tiled C accumulation (E=256 -> 2 grid steps).
    h_nodes, h_attrs = bgnn_forward(node_feats, attr_feats, edge_index, params,
                                    fast=True, e_tile=128)
    jax.block_until_ready((h_nodes, h_attrs))
    assert jnp.allclose(h_nodes, ref_nodes, atol=2e-2, rtol=2e-2)
    assert jnp.allclose(h_attrs, ref_attrs, atol=2e-2, rtol=2e-2)

    # Strict f32 path: tight semantic validation of the algebraic refactor.
    h_nodes32, h_attrs32 = bgnn_forward(node_feats, attr_feats, edge_index, params,
                                        fast=False, e_tile=128)
    jax.block_until_ready((h_nodes32, h_attrs32))
    assert jnp.allclose(h_nodes32, ref_nodes, atol=1e-4, rtol=1e-3)
    assert jnp.allclose(h_attrs32, ref_attrs, atol=1e-4, rtol=1e-3)

    print("KERNEL_OK")
</pallas_src>

<mosaic_0001>
module attributes {stable_mosaic.version = 11 : i64} {
  func.func @bgnn_kernel(%arg0: i32, %arg1: memref<1x128xi32, #tpu.memory_space<vmem>>, %arg2: memref<1x128xi32, #tpu.memory_space<vmem>>, %arg3: memref<64x128xf32, #tpu.memory_space<vmem>>, %arg4: memref<2x128x128xbf16, #tpu.memory_space<vmem>>, %arg5: memref<2x1x128xf32, #tpu.memory_space<vmem>>, %arg6: memref<2x128x128xbf16, #tpu.memory_space<vmem>>, %arg7: memref<2x1x128xf32, #tpu.memory_space<vmem>>, %arg8: memref<1x128xf32, #tpu.memory_space<vmem>>, %arg9: memref<64x128xf32, #tpu.memory_space<vmem>>, %arg10: memref<32x128xf32, #tpu.memory_space<vmem>>, %arg11: memref<64x32xf32, #tpu.memory_space<vmem>>) attributes {dimension_semantics = [#tpu.dimension_semantics<arbitrary>], iteration_bounds = array<i64: 2>, scalar_prefetch = 0 : i64, scratch_operands = 1 : i64, tpu.core_type = #tpu.core_type<tc>, window_params = [{transform_indices = @transform_0, window_bounds = array<i64: 1, 128>}, {transform_indices = @transform_1, window_bounds = array<i64: 1, 128>}, {pipeline_mode = #tpu.pipeline_mode<synchronous>, transform_indices = @transform_2, window_bounds = array<i64: 64, 128>}, {pipeline_mode = #tpu.pipeline_mode<synchronous>, transform_indices = @transform_3, window_bounds = array<i64: 2, 128, 128>}, {pipeline_mode = #tpu.pipeline_mode<synchronous>, transform_indices = @transform_4, window_bounds = array<i64: 2, 1, 128>}, {pipeline_mode = #tpu.pipeline_mode<synchronous>, transform_indices = @transform_5, window_bounds = array<i64: 2, 128, 128>}, {pipeline_mode = #tpu.pipeline_mode<synchronous>, transform_indices = @transform_6, window_bounds = array<i64: 2, 1, 128>}, {pipeline_mode = #tpu.pipeline_mode<synchronous>, transform_indices = @transform_7, window_bounds = array<i64: 1, 128>}, {pipeline_mode = #tpu.pipeline_mode<synchronous>, transform_indices = @transform_8, window_bounds = array<i64: 64, 128>}, {pipeline_mode = #tpu.pipeline_mode<synchronous>, transform_indices = @transform_9, window_bounds = array<i64: 32, 128>}]} {
    %c0_i32 = arith.constant 0 : i32
    %0 = arith.cmpi eq, %arg0, %c0_i32 : i32
    %1 = arith.extui %0 : i1 to i32
    %c0_i32_0 = arith.constant 0 : i32
    %2 = arith.cmpi ne, %1, %c0_i32_0 : i32
    scf.if %2 {
      %cst_9 = arith.constant 0.000000e+00 : f32
      %24 = vector.broadcast %cst_9 : f32 to vector<64x32xf32>
      %c0_10 = arith.constant 0 : index
      %c0_11 = arith.constant 0 : index
      %25 = vector.load %arg11[%c0_10, %c0_11] : memref<64x32xf32, #tpu.memory_space<vmem>>, vector<64x32xf32>
      tpu.vector_store %arg11[%c0_10, %c0_11], %24 {strides = array<i32>} : memref<64x32xf32, #tpu.memory_space<vmem>>, vector<64x32xf32>,
    } else {
    }
    %c0 = arith.constant 0 : index
    %c0_1 = arith.constant 0 : index
    %3 = vector.load %arg1[%c0, %c0_1] : memref<1x128xi32, #tpu.memory_space<vmem>>, vector<1x128xi32>
    %c0_2 = arith.constant 0 : index
    %c0_3 = arith.constant 0 : index
    %4 = vector.load %arg2[%c0_2, %c0_3] : memref<1x128xi32, #tpu.memory_space<vmem>>, vector<1x128xi32>
    %5 = tpu.iota {dimensions = array<i32: 0>} : vector<64x128xi32>
    %6 = tpu.iota {dimensions = array<i32: 0>} : vector<32x128xi32>
    %7 = vector.broadcast %3 : vector<1x128xi32> to vector<64x128xi32>
    %8 = arith.cmpi eq, %7, %5 : vector<64x128xi32>
    %9 = arith.extui %8 : vector<64x128xi1> to vector<64x128xi32>
    %10 = arith.sitofp %9 : vector<64x128xi32> to vector<64x128xf32>
    %11 = arith.truncf %10 : vector<64x128xf32> to vector<64x128xbf16>
    %12 = vector.broadcast %4 : vector<1x128xi32> to vector<32x128xi32>
    %13 = arith.cmpi eq, %12, %6 : vector<32x128xi32>
    %14 = arith.extui %13 : vector<32x128xi1> to vector<32x128xi32>
    %15 = arith.sitofp %14 : vector<32x128xi32> to vector<32x128xf32>
    %16 = arith.truncf %15 : vector<32x128xf32> to vector<32x128xbf16>
    %c0_4 = arith.constant 0 : index
    %c0_5 = arith.constant 0 : index
    %17 = vector.load %arg11[%c0_4, %c0_5] : memref<64x32xf32, #tpu.memory_space<vmem>>, vector<64x32xf32>
    %cst = arith.constant dense<0.000000e+00> : vector<64x32xf32>
    %18 = tpu.matmul %11, %16, %cst {dimension_numbers = #tpu.dot_dimension_numbers<[1], [1], [0], [0], [0, 0, 1, 0], [], []>} : vector<64x128xbf16>, vector<32x128xbf16>, vector<64x32xf32> -> vector<64x32xf32>
    %19 = arith.addf %17, %18 : vector<64x32xf32>
    %c0_6 = arith.constant 0 : index
    %c0_7 = arith.constant 0 : index
    %20 = vector.load %arg11[%c0_6, %c0_7] : memref<64x32xf32, #tpu.memory_space<vmem>>, vector<64x32xf32>
    tpu.vector_store %arg11[%c0_6, %c0_7], %19 {strides = array<i32>} : memref<64x32xf32, #tpu.memory_space<vmem>>, vector<64x32xf32>,
    %c1_i32 = arith.constant 1 : i32
    %21 = arith.cmpi eq, %arg0, %c1_i32 : i32
    %22 = arith.extui %21 : i1 to i32
    %c0_i32_8 = arith.constant 0 : i32
    %23 = arith.cmpi ne, %22, %c0_i32_8 : i32
    scf.if %23 {
      %c0_9 = arith.constant 0 : index
      %c0_10 = arith.constant 0 : index
      %24 = vector.load %arg11[%c0_9, %c0_10] : memref<64x32xf32, #tpu.memory_space<vmem>>, vector<64x32xf32>
      %cst_11 = arith.constant dense<0.000000e+00> : vector<64xf32>
      %25 = vector.multi_reduction <add>, %24, %cst_11 [1] : vector<64x32xf32> to vector<64xf32>
      %26 = vector.shape_cast %25 : vector<64xf32> to vector<64x1xf32>
      %27 = arith.truncf %24 : vector<64x32xf32> to vector<64x32xbf16>
      %28 = tpu.transpose %24, [1, 0] : vector<64x32xf32> -> vector<32x64xf32>
      %29 = arith.truncf %28 : vector<32x64xf32> to vector<32x64xbf16>
      %c0_12 = arith.constant 0 : index
      %c0_13 = arith.constant 0 : index
      %30 = vector.load %arg8[%c0_12, %c0_13] : memref<1x128xf32, #tpu.memory_space<vmem>>, vector<1x128xf32>
      %c0_14 = arith.constant 0 : index
      %c0_15 = arith.constant 0 : index
      %31 = vector.load %arg3[%c0_14, %c0_15] : memref<64x128xf32, #tpu.memory_space<vmem>>, vector<64x128xf32>
      %c0_16 = arith.constant 0 : index
      %c0_17 = arith.constant 0 : index
      %c0_18 = arith.constant 0 : index
      %32 = vector.load %arg4[%c0_16, %c0_17, %c0_18] : memref<2x128x128xbf16, #tpu.memory_space<vmem>>, vector<1x128x128xbf16>
      %33 = vector.shape_cast %32 : vector<1x128x128xbf16> to vector<128x128xbf16>
      %c0_19 = arith.constant 0 : index
      %c0_20 = arith.constant 0 : index
      %c0_21 = arith.constant 0 : index
      %34 = vector.load %arg6[%c0_19, %c0_20, %c0_21] : memref<2x128x128xbf16, #tpu.memory_space<vmem>>, vector<1x128x128xbf16>
      %35 = vector.shape_cast %34 : vector<1x128x128xbf16> to vector<128x128xbf16>
      %c0_22 = arith.constant 0 : index
      %c0_23 = arith.constant 0 : index
      %c0_24 = arith.constant 0 : index
      %36 = vector.load %arg5[%c0_22, %c0_23, %c0_24] : memref<2x1x128xf32, #tpu.memory_space<vmem>>, vector<1x1x128xf32>
      %37 = vector.shape_cast %36 : vector<1x1x128xf32> to vector<1x128xf32>
      %c0_25 = arith.constant 0 : index
      %c0_26 = arith.constant 0 : index
      %c0_27 = arith.constant 0 : index
      %38 = vector.load %arg7[%c0_25, %c0_26, %c0_27] : memref<2x1x128xf32, #tpu.memory_space<vmem>>, vector<1x1x128xf32>
      %39 = vector.shape_cast %38 : vector<1x1x128xf32> to vector<1x128xf32>
      %40 = arith.truncf %31 : vector<64x128xf32> to vector<64x128xbf16>
      %cst_28 = arith.constant dense<0.000000e+00> : vector<64x128xf32>
      %41 = tpu.matmul %40, %33, %cst_28 {dimension_numbers = #tpu.dot_dimension_numbers<[1], [0], [0], [1], [0, 0, 1, 1], [], []>} : vector<64x128xbf16>, vector<128x128xbf16>, vector<64x128xf32> -> vector<64x128xf32>
      %42 = vector.broadcast %37 : vector<1x128xf32> to vector<64x128xf32>
      %43 = arith.addf %41, %42 : vector<64x128xf32>
      %cst_29 = arith.constant 0.000000e+00 : f32
      %44 = vector.broadcast %cst_29 : f32 to vector<64x128xf32>
      %45 = arith.maximumf %43, %44 : vector<64x128xf32>
      %46 = vector.broadcast %30 : vector<1x128xf32> to vector<64x128xf32>
      %47 = arith.mulf %45, %46 : vector<64x128xf32>
      %cst_30 = arith.constant dense<0.000000e+00> : vector<64xf32>
      %48 = vector.multi_reduction <add>, %47, %cst_30 [1] : vector<64x128xf32> to vector<64xf32>
      %49 = vector.shape_cast %48 : vector<64xf32> to vector<64x1xf32>
      %cst_31 = arith.constant 0.000000e+00 : f32
      %50 = vector.broadcast %cst_31 : f32 to vector<64x1xf32>
      %51 = arith.cmpf ogt, %26, %50 : vector<64x1xf32>
      %cst_32 = arith.constant 0xFF800000 : f32
      %52 = vector.broadcast %cst_32 : f32 to vector<64x1xf32>
      %53 = arith.select %51, %49, %52 : vector<64x1xi1>, vector<64x1xf32>
      %54 = vector.shape_cast %53 : vector<64x1xf32> to vector<1x64x1xf32>
      %cst_33 = arith.constant dense<0xFF800000> : vector<1xf32>
      %55 = vector.multi_reduction <maximumf>, %54, %cst_33 [1, 2] : vector<1x64x1xf32> to vector<1xf32>
      %56 = vector.shape_cast %55 : vector<1xf32> to vector<1x1x1xf32>
      %57 = vector.extract %56[0, 0, 0] : f32 from vector<1x1x1xf32>
      %58 = vector.broadcast %57 : f32 to vector<1x1xf32>
      %cst_34 = arith.constant 0xFF800000 : f32
      %59 = vector.broadcast %cst_34 : f32 to vector<1x1xf32>
      %60 = arith.cmpf ogt, %58, %59 : vector<1x1xf32>
      %cst_35 = arith.constant 0.000000e+00 : f32
      %61 = vector.broadcast %cst_35 : f32 to vector<1x1xf32>
      %62 = arith.select %60, %58, %61 : vector<1x1xi1>, vector<1x1xf32>
      %63 = vector.broadcast %62 : vector<1x1xf32> to vector<64x1xf32>
      %64 = arith.subf %49, %63 : vector<64x1xf32>
      %65 = math.exp %64 : vector<64x1xf32>
      %66 = arith.mulf %26, %65 : vector<64x1xf32>
      %67 = vector.shape_cast %66 : vector<64x1xf32> to vector<1x64x1xf32>
      %cst_36 = arith.constant dense<0.000000e+00> : vector<1xf32>
      %68 = vector.multi_reduction <add>, %67, %cst_36 [1, 2] : vector<1x64x1xf32> to vector<1xf32>
      %69 = vector.shape_cast %68 : vector<1xf32> to vector<1x1x1xf32>
      %70 = vector.extract %69[0, 0, 0] : f32 from vector<1x1x1xf32>
      %71 = vector.broadcast %70 : f32 to vector<1x1xf32>
      %cst_37 = arith.constant 0.000000e+00 : f32
      %72 = vector.broadcast %cst_37 : f32 to vector<1x1xf32>
      %73 = arith.cmpf ogt, %71, %72 : vector<1x1xf32>
      %74 = tpu.reciprocal %71 {approx = true} : vector<1x1xf32> -> vector<1x1xf32>
      %cst_38 = arith.constant 0.000000e+00 : f32
      %75 = vector.broadcast %cst_38 : f32 to vector<1x1xf32>
      %76 = arith.select %73, %74, %75 : vector<1x1xi1>, vector<1x1xf32>
      %77 = vector.broadcast %76 : vector<1x1xf32> to vector<64x1xf32>
      %78 = arith.mulf %65, %77 : vector<64x1xf32>
      %79 = vector.broadcast %78 : vector<64x1xf32> to vector<64x128xf32>
      %80 = arith.mulf %45, %79 : vector<64x128xf32>
      %81 = arith.truncf %80 : vector<64x128xf32> to vector<64x128xbf16>
      %cst_39 = arith.constant dense<0.000000e+00> : vector<32x128xf32>
      %82 = tpu.matmul %29, %81, %cst_39 {dimension_numbers = #tpu.dot_dimension_numbers<[1], [0], [0], [1], [0, 0, 1, 1], [], []>} : vector<32x64xbf16>, vector<64x128xbf16>, vector<32x128xf32> -> vector<32x128xf32>
      %83 = arith.truncf %82 : vector<32x128xf32> to vector<32x128xbf16>
      %cst_40 = arith.constant dense<0.000000e+00> : vector<32x128xf32>
      %84 = tpu.matmul %83, %35, %cst_40 {dimension_numbers = #tpu.dot_dimension_numbers<[1], [0], [0], [1], [0, 0, 1, 1], [], []>} : vector<32x128xbf16>, vector<128x128xbf16>, vector<32x128xf32> -> vector<32x128xf32>
      %85 = vector.broadcast %39 : vector<1x128xf32> to vector<32x128xf32>
      %86 = arith.addf %84, %85 : vector<32x128xf32>
      %cst_41 = arith.constant 0.000000e+00 : f32
      %87 = vector.broadcast %cst_41 : f32 to vector<32x128xf32>
      %88 = arith.maximumf %86, %87 : vector<32x128xf32>
      %89 = arith.truncf %88 : vector<32x128xf32> to vector<32x128xbf16>
      %cst_42 = arith.constant dense<0.000000e+00> : vector<64x128xf32>
      %90 = tpu.matmul %27, %89, %cst_42 {dimension_numbers = #tpu.dot_dimension_numbers<[1], [0], [0], [1], [0, 0, 1, 1], [], []>} : vector<64x32xbf16>, vector<32x128xbf16>, vector<64x128xf32> -> vector<64x128xf32>
      %91 = vector.broadcast %78 : vector<64x1xf32> to vector<64x128xf32>
      %92 = arith.mulf %90, %91 : vector<64x128xf32>
      %93 = arith.addf %31, %92 : vector<64x128xf32>
      %c1 = arith.constant 1 : index
      %c0_43 = arith.constant 0 : index
      %c0_44 = arith.constant 0 : index
      %94 = vector.load %arg4[%c1, %c0_43, %c0_44] : memref<2x128x128xbf16, #tpu.memory_space<vmem>>, vector<1x128x128xbf16>
      %95 = vector.shape_cast %94 : vector<1x128x128xbf16> to vector<128x128xbf16>
      %c1_45 = arith.constant 1 : index
      %c0_46 = arith.constant 0 : index
      %c0_47 = arith.constant 0 : index
      %96 = vector.load %arg6[%c1_45, %c0_46, %c0_47] : memref<2x128x128xbf16, #tpu.memory_space<vmem>>, vector<1x128x128xbf16>
      %97 = vector.shape_cast %96 : vector<1x128x128xbf16> to vector<128x128xbf16>
      %c1_48 = arith.constant 1 : index
      %c0_49 = arith.constant 0 : index
      %c0_50 = arith.constant 0 : index
      %98 = vector.load %arg5[%c1_48, %c0_49, %c0_50] : memref<2x1x128xf32, #tpu.memory_space<vmem>>, vector<1x1x128xf32>
      %99 = vector.shape_cast %98 : vector<1x1x128xf32> to vector<1x128xf32>
      %c1_51 = arith.constant 1 : index
      %c0_52 = arith.constant 0 : index
      %c0_53 = arith.constant 0 : index
      %100 = vector.load %arg7[%c1_51, %c0_52, %c0_53] : memref<2x1x128xf32, #tpu.memory_space<vmem>>, vector<1x1x128xf32>
      %101 = vector.shape_cast %100 : vector<1x1x128xf32> to vector<1x128xf32>
      %102 = arith.truncf %93 : vector<64x128xf32> to vector<64x128xbf16>
      %cst_54 = arith.constant dense<0.000000e+00> : vector<64x128xf32>
      %103 = tpu.matmul %102, %95, %cst_54 {dimension_numbers = #tpu.dot_dimension_numbers<[1], [0], [0], [1], [0, 0, 1, 1], [], []>} : vector<64x128xbf16>, vector<128x128xbf16>, vector<64x128xf32> -> vector<64x128xf32>
      %104 = vector.broadcast %99 : vector<1x128xf32> to vector<64x128xf32>
      %105 = arith.addf %103, %104 : vector<64x128xf32>
      %cst_55 = arith.constant 0.000000e+00 : f32
      %106 = vector.broadcast %cst_55 : f32 to vector<64x128xf32>
      %107 = arith.maximumf %105, %106 : vector<64x128xf32>
      %108 = vector.broadcast %30 : vector<1x128xf32> to vector<64x128xf32>
      %109 = arith.mulf %107, %108 : vector<64x128xf32>
      %cst_56 = arith.constant dense<0.000000e+00> : vector<64xf32>
      %110 = vector.multi_reduction <add>, %109, %cst_56 [1] : vector<64x128xf32> to vector<64xf32>
      %111 = vector.shape_cast %110 : vector<64xf32> to vector<64x1xf32>
      %cst_57 = arith.constant 0.000000e+00 : f32
      %112 = vector.broadcast %cst_57 : f32 to vector<64x1xf32>
      %113 = arith.cmpf ogt, %26, %112 : vector<64x1xf32>
      %cst_58 = arith.constant 0xFF800000 : f32
      %114 = vector.broadcast %cst_58 : f32 to vector<64x1xf32>
      %115 = arith.select %113, %111, %114 : vector<64x1xi1>, vector<64x1xf32>
      %116 = vector.shape_cast %115 : vector<64x1xf32> to vector<1x64x1xf32>
      %cst_59 = arith.constant dense<0xFF800000> : vector<1xf32>
      %117 = vector.multi_reduction <maximumf>, %116, %cst_59 [1, 2] : vector<1x64x1xf32> to vector<1xf32>
      %118 = vector.shape_cast %117 : vector<1xf32> to vector<1x1x1xf32>
      %119 = vector.extract %118[0, 0, 0] : f32 from vector<1x1x1xf32>
      %120 = vector.broadcast %119 : f32 to vector<1x1xf32>
      %cst_60 = arith.constant 0xFF800000 : f32
      %121 = vector.broadcast %cst_60 : f32 to vector<1x1xf32>
      %122 = arith.cmpf ogt, %120, %121 : vector<1x1xf32>
      %cst_61 = arith.constant 0.000000e+00 : f32
      %123 = vector.broadcast %cst_61 : f32 to vector<1x1xf32>
      %124 = arith.select %122, %120, %123 : vector<1x1xi1>, vector<1x1xf32>
      %125 = vector.broadcast %124 : vector<1x1xf32> to vector<64x1xf32>
      %126 = arith.subf %111, %125 : vector<64x1xf32>
      %127 = math.exp %126 : vector<64x1xf32>
      %128 = arith.mulf %26, %127 : vector<64x1xf32>
      %129 = vector.shape_cast %128 : vector<64x1xf32> to vector<1x64x1xf32>
      %cst_62 = arith.constant dense<0.000000e+00> : vector<1xf32>
      %130 = vector.multi_reduction <add>, %129, %cst_62 [1, 2] : vector<1x64x1xf32> to vector<1xf32>
      %131 = vector.shape_cast %130 : vector<1xf32> to vector<1x1x1xf32>
      %132 = vector.extract %131[0, 0, 0] : f32 from vector<1x1x1xf32>
      %133 = vector.broadcast %132 : f32 to vector<1x1xf32>
      %cst_63 = arith.constant 0.000000e+00 : f32
      %134 = vector.broadcast %cst_63 : f32 to vector<1x1xf32>
      %135 = arith.cmpf ogt, %133, %134 : vector<1x1xf32>
      %136 = tpu.reciprocal %133 {approx = true} : vector<1x1xf32> -> vector<1x1xf32>
      %cst_64 = arith.constant 0.000000e+00 : f32
      %137 = vector.broadcast %cst_64 : f32 to vector<1x1xf32>
      %138 = arith.select %135, %136, %137 : vector<1x1xi1>, vector<1x1xf32>
      %139 = vector.broadcast %138 : vector<1x1xf32> to vector<64x1xf32>
      %140 = arith.mulf %127, %139 : vector<64x1xf32>
      %141 = vector.broadcast %140 : vector<64x1xf32> to vector<64x128xf32>
      %142 = arith.mulf %107, %141 : vector<64x128xf32>
      %143 = arith.truncf %142 : vector<64x128xf32> to vector<64x128xbf16>
      %cst_65 = arith.constant dense<0.000000e+00> : vector<32x128xf32>
      %144 = tpu.matmul %29, %143, %cst_65 {dimension_numbers = #tpu.dot_dimension_numbers<[1], [0], [0], [1], [0, 0, 1, 1], [], []>} : vector<32x64xbf16>, vector<64x128xbf16>, vector<32x128xf32> -> vector<32x128xf32>
      %145 = arith.truncf %144 : vector<32x128xf32> to vector<32x128xbf16>
      %cst_66 = arith.constant dense<0.000000e+00> : vector<32x128xf32>
      %146 = tpu.matmul %145, %97, %cst_66 {dimension_numbers = #tpu.dot_dimension_numbers<[1], [0], [0], [1], [0, 0, 1, 1], [], []>} : vector<32x128xbf16>, vector<128x128xbf16>, vector<32x128xf32> -> vector<32x128xf32>
      %147 = vector.broadcast %101 : vector<1x128xf32> to vector<32x128xf32>
      %148 = arith.addf %146, %147 : vector<32x128xf32>
      %cst_67 = arith.constant 0.000000e+00 : f32
      %149 = vector.broadcast %cst_67 : f32 to vector<32x128xf32>
      %150 = arith.maximumf %148, %149 : vector<32x128xf32>
      %151 = arith.truncf %150 : vector<32x128xf32> to vector<32x128xbf16>
      %cst_68 = arith.constant dense<0.000000e+00> : vector<64x128xf32>
      %152 = tpu.matmul %27, %151, %cst_68 {dimension_numbers = #tpu.dot_dimension_numbers<[1], [0], [0], [1], [0, 0, 1, 1], [], []>} : vector<64x32xbf16>, vector<32x128xbf16>, vector<64x128xf32> -> vector<64x128xf32>
      %153 = vector.broadcast %140 : vector<64x1xf32> to vector<64x128xf32>
      %154 = arith.mulf %152, %153 : vector<64x128xf32>
      %155 = arith.addf %93, %154 : vector<64x128xf32>
      %c0_69 = arith.constant 0 : index
      %c0_70 = arith.constant 0 : index
      %156 = vector.load %arg9[%c0_69, %c0_70] : memref<64x128xf32, #tpu.memory_space<vmem>>, vector<64x128xf32>
      tpu.vector_store %arg9[%c0_69, %c0_70], %155 {strides = array<i32>} : memref<64x128xf32, #tpu.memory_space<vmem>>, vector<64x128xf32>,
      %c0_71 = arith.constant 0 : index
      %c0_72 = arith.constant 0 : index
      %157 = vector.load %arg10[%c0_71, %c0_72] : memref<32x128xf32, #tpu.memory_space<vmem>>, vector<32x128xf32>
      tpu.vector_store %arg10[%c0_71, %c0_72], %150 {strides = array<i32>} : memref<32x128xf32, #tpu.memory_space<vmem>>, vector<32x128xf32>,
    } else {
    }
    return
  }
  func.func @transform_0(%arg0: i32) -> (i32, i32) {
    %c0_i32 = arith.constant 0 : i32
    %c0_i32_0 = arith.constant 0 : i32
    return %c0_i32, %arg0 : i32, i32
  }
  func.func @transform_1(%arg0: i32) -> (i32, i32) {
    %c0_i32 = arith.constant 0 : i32
    %c0_i32_0 = arith.constant 0 : i32
    return %c0_i32, %arg0 : i32, i32
  }
  func.func @transform_2(%arg0: i32) -> (i32, i32) {
    %c0_i32 = arith.constant 0 : i32
    %c0_i32_0 = arith.constant 0 : i32
    %c0_i32_1 = arith.constant 0 : i32
    return %c0_i32, %c0_i32_0 : i32, i32
  }
  func.func @transform_3(%arg0: i32) -> (i32, i32, i32) {
    %c0_i32 = arith.constant 0 : i32
    %c0_i32_0 = arith.constant 0 : i32
    %c0_i32_1 = arith.constant 0 : i32
    %c0_i32_2 = arith.constant 0 : i32
    return %c0_i32, %c0_i32_0, %c0_i32_1 : i32, i32, i32
  }
  func.func @transform_4(%arg0: i32) -> (i32, i32, i32) {
    %c0_i32 = arith.constant 0 : i32
    %c0_i32_0 = arith.constant 0 : i32
    %c0_i32_1 = arith.constant 0 : i32
    %c0_i32_2 = arith.constant 0 : i32
    return %c0_i32, %c0_i32_0, %c0_i32_1 : i32, i32, i32
  }
  func.func @transform_5(%arg0: i32) -> (i32, i32, i32) {
    %c0_i32 = arith.constant 0 : i32
    %c0_i32_0 = arith.constant 0 : i32
    %c0_i32_1 = arith.constant 0 : i32
    %c0_i32_2 = arith.constant 0 : i32
    return %c0_i32, %c0_i32_0, %c0_i32_1 : i32, i32, i32
  }
  func.func @transform_6(%arg0: i32) -> (i32, i32, i32) {
    %c0_i32 = arith.constant 0 : i32
    %c0_i32_0 = arith.constant 0 : i32
    %c0_i32_1 = arith.constant 0 : i32
    %c0_i32_2 = arith.constant 0 : i32
    return %c0_i32, %c0_i32_0, %c0_i32_1 : i32, i32, i32
  }
  func.func @transform_7(%arg0: i32) -> (i32, i32) {
    %c0_i32 = arith.constant 0 : i32
    %c0_i32_0 = arith.constant 0 : i32
    %c0_i32_1 = arith.constant 0 : i32
    return %c0_i32, %c0_i32_0 : i32, i32
  }
  func.func @transform_8(%arg0: i32) -> (i32, i32) {
    %c0_i32 = arith.constant 0 : i32
    %c0_i32_0 = arith.constant 0 : i32
    %c0_i32_1 = arith.constant 0 : i32
    return %c0_i32, %c0_i32_0 : i32, i32
  }
  func.func @transform_9(%arg0: i32) -> (i32, i32) {
    %c0_i32 = arith.constant 0 : i32
    %c0_i32_0 = arith.constant 0 : i32
    %c0_i32_1 = arith.constant 0 : i32
    return %c0_i32, %c0_i32_0 : i32, i32
  }
}

</mosaic_0001>

<bundles_post_ra>
// kernel: tpu_custom_call.1
= control target key start
LH: loop header
LB: loop body
LE: loop exit
PB: predicated region body
PF: predicated region fallthrough
CT: control target
= control target key end

     0   :  { %s3346_s0 = inlined_call_operand.hbm [shape: s32[1,256], index: 0, kind: input, shape index: {}]   ;;  %s3347_s1 = inlined_call_operand.vmem [shape: s32[1,256], index: 1, kind: input, shape index: {}]   ;;  %s3348_s2 = inlined_call_operand.hbm [shape: f32[64,128], index: 2, kind: input, shape index: {}]   ;;  %s3349_s3 = inlined_call_operand.hbm [shape: bf16[2,128,128], index: 3, kind: input, shape index: {}]   ;;  %s3350_s4 = inlined_call_operand.vmem [shape: f32[2,1,128], index: 4, kind: input, shape index: {}]   ;;  %s3351_s5 = inlined_call_operand.hbm [shape: bf16[2,128,128], index: 5, kind: input, shape index: {}]   ;;  %s3352_s6 = inlined_call_operand.vmem [shape: f32[2,1,128], index: 6, kind: input, shape index: {}]   ;;  %s3353_s7 = inlined_call_operand.vmem [shape: f32[1,128], index: 7, kind: input, shape index: {}]   ;;  %s3354_s8 = inlined_call_operand.hbm [shape: f32[64,128], index: 8, kind: output, shape index: {0}]   ;;  %s3355_s9 = inlined_call_operand.hbm [shape: f32[32,128], index: 9, kind: output, shape index: {1}]  }
   0x1   :  { %3374 = sst [smem:[#allocation20_spill]] %s3348_s2 }
   0x2   :  { %3375 = sst [smem:[#allocation21_spill]] %s3355_s9 }
   0x3   :  { %15 = vsyncpa [#allocation4], 0 }
   0x4   :  { %17 = vsyncpa [#allocation4 + $0x1], 0 }
   0x5   :  { %18 = vsyncpa [#allocation7], 0 }
   0x6   :  { %19 = vsyncpa [#allocation10], 0 }
   0x7   :  { %20 = vsyncpa [#allocation5], 0 }
   0x8   :  { %21 = vsyncpa [#allocation13], 0  ;;  %s2649_s30 = smov 0   ;;  %s2651_s10 = smov 0  }
   0x9   :  { %s2653_s11 = smov 0   ;;  %s2655_s12 = smov 0  }
   0xa LB: > { %s2668_s13 = sadd.s32 4294967295, %s2583_s12   ;;  %p47_p0 = scmp.ne.s32.totalorder %s2575_s10, %s2571_s30  ;;  %s2583_s12 = sphi %s2655_s12, %s3407_s12   ;;  %s2579_s11 = sphi %s2653_s11, %s3406_s11   ;;  %s2575_s10 = sphi %s2651_s10, %s3405_s10   ;;  %s2571_s30 = sphi %s2649_s30, %s3404_s30  }
   0xb   : > { %p3356_p1 = scmp.eq.s32.totalorder %s2668_s13, 0  ;;  %p1877_p2 = scmp.ge.s32.totalorder %s2583_s12, 1 }
   0xc   : > { %p252_p3 = scmp.lt.s32.totalorder %s2583_s12, 3  ;;  %s2585_s16 = smov [#allocation6]  }
   0xd   : > { %p2677_p5 = por %p3356_p1, %p47_p0  ;;  %s264_s17 = sshll.u32 %s2585_s16, 4  ;;  %s265_s17 = int_to_ptr.vmem [resolvable:$true] %s264_s17 }
   0xe   : > { %p2681_p6 = pnand %p1877_p2, %p252_p3  ;;  %s2586_s19 = smov [#allocation8]  }
   0xf   : > { %s3376_s14 = scalar_select %p2677_p5, 1, 0 }
  0x10   : > { %s3377_s15 = scalar_select %p2681_p6, 1, 0 }
  0x11   : > { %p2228_p7 = pneg %p2681_p6  ;;  %s277_s20 = sshll.u32 %s2586_s19, 4  ;;  %s2693_s20 = int_to_ptr.vmem [resolvable:$true] %s277_s20 }
  0x12   : > { %s3379_s2 = sld [smem:[#allocation20_spill]] }
  0x13   : > { %p2689_p8 = pnand %p2228_p7, %p3356_p1 }
  0x15   : > { %p2703_p10 = pneg %p2689_p8 }
  0x18   : > { %s2367_s23 = scalar_lea.hbm %s3379_s2, 1024 }
  0x19   : > { %p2368_p9 = scmp.ne.s32.totalorder %s3379_s2, %s2367_s23  ;;  %p2374_p13 = scmp.lt.u32.totalorder %s2367_s23, %s3379_s2 }
  0x1b   : > { %p2370_p11 = pnand %p2703_p10, %p2368_p9 }
  0x1d   : > { %p2371_p12 = pneg %p2370_p11 }
  0x1f   : > { %p2376_p0 = pnand %p2374_p13, %p2371_p12 }
  0x21   : > { %2379 = shalt.err (!%p2376_p0)
}
  0x22   : > { %s2380_s29 = scalar_lea.vmem %s265_s17, 1024  ;;  %p2388_p4 = scmp.lt.s32.totalorder %s265_s17, %s265_s17 }
  0x23   : > { %p2381_p2 = scmp.ne.s32.totalorder %s265_s17, %s2380_s29  ;;  %p2389_p1 = scmp.lt.s32.totalorder %s2380_s29, %s2380_s29 }
  0x25   : > { %p2383_p3 = pnand %p2381_p2, %p2703_p10  ;;  %p2390_p5 = por %p2389_p1, %p2388_p4 }
  0x27   : > { %p2384_p7 = pneg %p2383_p3 }
  0x29   : > { %p2391_p6 = pnand %p2390_p5, %p2384_p7 }
  0x2b   : > { %2394 = shalt.err (!%p2391_p6)
}
  0x2c   : > { %s2587_s30 = smov 128   ;;  %s2588_s16 = smov 8  }
  0x2d   : > { %2231 = dma.hbm_to_vmem [thread:$0]  (!%p2689_p8), %s3379_s2, 1024, %s265_s17, [#allocation7], %s2587_s30, %s2587_s30, %s2588_s16  }
  0x2e   : > { %s2395_s24 = scalar_lea.hbm %s3349_s3, 2048 }
  0x2f   : > { %p2396_p9 = scmp.ne.s32.totalorder %s3349_s3, %s2395_s24  ;;  %p2402_p5 = scmp.lt.u32.totalorder %s2395_s24, %s3349_s3 }
  0x31   : > { %p2398_p1 = pnand %p2396_p9, %p2703_p10 }
  0x33   : > { %p2399_p4 = pneg %p2398_p1 }
  0x35   : > { %p2404_p6 = pnand %p2402_p5, %p2399_p4 }
  0x37   : > { %2407 = shalt.err (!%p2404_p6)
}
  0x38   : > { %s2408_s17 = scalar_lea.vmem %s2693_s20, 2048  ;;  %p2416_p0 = scmp.lt.s32.totalorder %s2693_s20, %s2693_s20 }
  0x39   : > { %p2409_p11 = scmp.ne.s32.totalorder %s2693_s20, %s2408_s17  ;;  %p2417_p2 = scmp.lt.s32.totalorder %s2408_s17, %s2408_s17 }
  0x3b   : > { %p2411_p12 = pnand %p2409_p11, %p2703_p10  ;;  %p2418_p3 = por %p2417_p2, %p2416_p0 }
  0x3d   : > { %p2412_p13 = pneg %p2411_p12 }
  0x3f   : > { %p2419_p7 = pnand %p2418_p3, %p2412_p13 }
  0x41   : > { %2422 = shalt.err (!%p2419_p7)
}
  0x42   : > { %s2589_s30 = smov 64   ;;  %s2590_s16 = smov 4  }
  0x43   : > { %2234 = dma.hbm_to_vmem [thread:$0]  (!%p2689_p8), %s3349_s3, 2048, %s2693_s20, [#allocation7], %s2589_s30, %s2589_s30, %s2590_s16  }
  0x44   : > { %s2591_s22 = smov [#allocation9]   ;;  %s2743_s24 = sadd.s32 1, %s2583_s12  }
  0x45   : > { %s293_s23 = sshll.u32 %s2591_s22, 4  ;;  %s2423_s28 = scalar_lea.hbm %s3351_s5, 2048  ;;  %s294_s23 = int_to_ptr.vmem [resolvable:$true] %s293_s23 }
  0x46   : > { %p2424_p9 = scmp.ne.s32.totalorder %s3351_s5, %s2423_s28  ;;  %p2430_p5 = scmp.lt.u32.totalorder %s2423_s28, %s3351_s5 }
  0x48   : > { %p2426_p1 = pnand %p2424_p9, %p2703_p10 }
  0x4a   : > { %p2427_p4 = pneg %p2426_p1 }
  0x4c   : > { %p2432_p6 = pnand %p2430_p5, %p2427_p4 }
  0x4e   : > { %2435 = shalt.err (!%p2432_p6)
}
  0x4f   : > { %s2436_s20 = scalar_lea.vmem %s294_s23, 2048  ;;  %p2444_p0 = scmp.lt.s32.totalorder %s294_s23, %s294_s23 }
  0x50   : > { %p2437_p11 = scmp.ne.s32.totalorder %s294_s23, %s2436_s20  ;;  %p2445_p2 = scmp.lt.s32.totalorder %s2436_s20, %s2436_s20 }
  0x52   : > { %p2439_p12 = pnand %p2437_p11, %p2703_p10  ;;  %p2446_p3 = por %p2445_p2, %p2444_p0 }
  0x54   : > { %p2440_p13 = pneg %p2439_p12 }
  0x56   : > { %p2447_p7 = pnand %p2446_p3, %p2440_p13 }
  0x58   : > { %2450 = shalt.err (!%p2447_p7)
}
  0x59   : > { %2237 = dma.hbm_to_vmem [thread:$0]  (!%p2689_p8), %s3351_s5, 2048, %s294_s23, [#allocation10], %s2589_s30, %s2589_s30, %s2590_s16  }
  0x5a   : > { %s31_s2 = ssub.s32 %s2583_s12, %s2743_s24  ;;  %s34_s9 = sadd.s32 1, %s2579_s11 }
  0x5b   : > { %p32_p10 = scmp.eq.s32.totalorder %s31_s2, 0  ;;  %p41_p9 = scmp.ne.s32.totalorder %s2579_s11, %s2575_s10 }
  0x5c   : > { %p42_p1 = scmp.eq.s32.totalorder %s2583_s12, 0  ;;  %p2245_p4 = scmp.lt.s32.totalorder %s2583_s12, 2 }
  0x5d   : > { %s2771_s18 = scalar_select %p32_p10, %s2579_s11, %s34_s9  }
  0x5e   : > { %p43_p5 = por %p42_p1, %p41_p9  ;;  %s313_s26 = sand.u32 1, %s2579_s11  }
  0x5f   : > { %s1882_s22 = sshll.u32 %s2583_s12, 4  ;;  %s316_s25 = scalar_lea.vmem [#allocation3], %s313_s26 }
  0x60   : > { %s323_s27 = sshll.u32 %s316_s25, 4  ;;  %s2778_s17 = scalar_lea.hbm %s3346_s0, %s1882_s22  ;;  %s2780_s27 = int_to_ptr.vmem [resolvable:$true] %s323_s27 }
  0x61   : > { %p2782_p8 = pnand %p2245_p4, %p43_p5  ;;  %s314_s12 = scalar_lea.sflag [#allocation4], %s313_s26 }
  0x62   : > { %s2451_s16 = scalar_lea.hbm %s2778_s17, 16  ;;  %s2456_s19 = scalar_lea.hbm %s3346_s0, 32 }
  0x63   : > { %p2452_p6 = scmp.ne.s32.totalorder %s2778_s17, %s2451_s16  ;;  %p2453_p11 = pneg %p2782_p8 }
  0x64   : > { %p2457_p0 = scmp.lt.u32.totalorder %s2778_s17, %s3346_s0  ;;  %p2458_p2 = scmp.lt.u32.totalorder %s2456_s19, %s2451_s16 }
  0x65   : > { %p2454_p12 = pnand %p2453_p11, %p2452_p6  ;;  %p2460_p7 = scmp.lt.u32.totalorder %s2451_s16, %s2778_s17 }
  0x66   : > { %p2459_p3 = por %p2458_p2, %p2457_p0 }
  0x67   : > { %p2455_p13 = pneg %p2454_p12 }
  0x68   : > { %p2461_p10 = por %p2460_p7, %p2459_p3 }
  0x6a   : > { %p2462_p9 = pnand %p2461_p10, %p2455_p13 }
  0x6c   : > { %2465 = shalt.err (!%p2462_p9)
}
  0x6d   : > { %s2466_s9 = scalar_lea.vmem %s2780_s27, 16  ;;  %s2592_s26 = smov [#allocation3]  }
  0x6e   : > { %p2467_p1 = scmp.ne.s32.totalorder %s2780_s27, %s2466_s9  ;;  %s2471_s22 = sshll.u32 %s2592_s26, 4  ;;  %s2472_s22 = int_to_ptr.vmem [resolvable:$false] %s2471_s22 }
  0x6f   : > { %s2473_s25 = scalar_lea.vmem %s2472_s22, 32  ;;  %p2474_p6 = scmp.lt.s32.totalorder %s2780_s27, %s2472_s22 }
  0x70   : > { %p2469_p4 = pnand %p2467_p1, %p2453_p11  ;;  %p2475_p12 = scmp.lt.s32.totalorder %s2473_s25, %s2466_s9 }
  0x72   : > { %p2470_p5 = pneg %p2469_p4  ;;  %p2476_p0 = por %p2475_p12, %p2474_p6 }
  0x74   : > { %p2477_p2 = pnand %p2476_p0, %p2470_p5 }
  0x76   : > { %2480 = shalt.err (!%p2477_p2)
}
  0x77   : > { %2241 = dma.hbm_to_vmem [thread:$0]  (!%p2782_p8), %s2778_s17, 16, %s2780_s27, %s314_s12  }
  0x78   : > { %p3382_p13 = scmp.ne.s32.totalorder %s3377_s15, 0 }
  0x79   : > { %s340_s28 = sand.u32 (!%p3382_p13), 1, %s2575_s10   ;;  %p3383_p11 = scmp.ne.s32.totalorder (!%p3382_p13), %s3376_s14, 0 }
  0x7a   : > { %338 = sbr.rel (%p3382_p13) target bundleno = 3273 (0xcc9), region = 52  ;;  %s341_s29 = scalar_lea.sflag (!%p3382_p13), [#allocation4], %s340_s28 }
  0x7b   : > { %s343_s16 = scalar_lea.vmem (!%p3382_p13), [#allocation3], %s340_s28 }
  0x81   : > { %2550 = dma.done.wait (%p3383_p11), %s341_s29, 16  }
  0x82   : > { %2552 = vsyncadd (%p3383_p11), %s341_s29, 4294967280  ;;  %p3384_p3 = scmp.eq.s32.totalorder %s2668_s13, 0 }
  0x84   : > { %2554 = dma.done.wait (%p3384_p3), [#allocation7], 3072   ;;  %p3385_p7 = pmov %p3384_p3 }
  0x85   : > { %p3386_p8 = pmov %p3384_p3 }
  0x86   : > { %2556 = vsyncadd (%p3385_p7), [#allocation7], 4294964224 }
  0x87   : > { %2558 = dma.done.wait (%p3386_p8), [#allocation10], 2048   ;;  %p3387_p10 = pmov %p3384_p3 }
  0x88   : > { %p387_p9 = scmp.lt.s32.totalorder %s2668_s13, 1  ;;  %p3388_p1 = scmp.ne.s32.totalorder %s2668_s13, 0 }
  0x89   : > { %2560 = vsyncadd (%p3387_p10), [#allocation10], 4294965248  ;;  %vm395_vm0 = vcmask (!%p3388_p1), 261120   ;;  %v2593_v0 = vmov (!%p3388_p1), 0.0  }
  0x8a   : > { %s388_s15 = scalar_select %p387_p9, %s2668_s13, 1 }
  0x8b   : > { %394 = sbr.rel (%p3388_p1) target bundleno = 146 (0x92), region = 72  ;;  %396 = vst.msk [vmem:[#allocation2] sm:$0xff] (!%p3388_p1), %vm395_vm0, %v2593_v0  ;;  %397 = vst.msk [vmem:[#allocation2 + $0x8] sm:$0xff] (!%p3388_p1), %vm395_vm0, %v2593_v0 }
  0x8c   : > { %s389_s14 = scalar_lea.vmem %s3347_s1, %s388_s15  ;;  %398 = vst.msk [vmem:[#allocation2 + $0x10] sm:$0xff] (!%p3388_p1), %vm395_vm0, %v2593_v0  ;;  %399 = vst.msk [vmem:[#allocation2 + $0x18] sm:$0xff] (!%p3388_p1), %vm395_vm0, %v2593_v0 }
  0x8d   : > { %400 = vst.msk [vmem:[#allocation2 + $0x20] sm:$0xff] (!%p3388_p1), %vm395_vm0, %v2593_v0  ;;  %401 = vst.msk [vmem:[#allocation2 + $0x28] sm:$0xff] (!%p3388_p1), %vm395_vm0, %v2593_v0 }
  0x8e   : > { %402 = vst.msk [vmem:[#allocation2 + $0x30] sm:$0xff] (!%p3388_p1), %vm395_vm0, %v2593_v0  ;;  %403 = vst.msk [vmem:[#allocation2 + $0x38] sm:$0xff] (!%p3388_p1), %vm395_vm0, %v2593_v0 }
  0x92 PF: > { %v406_v1 = vlaneseq  ;;  %v1897_v2 = vld [vmem:[%s389_s14] ss:$0 sm:$0xff]  ;;  %v2594_v10 = vmov 1.0|1.0   ;;  %v466_v25 = vld [vmem:[#allocation2 + $0x8] sm:$0xff]  ;;  %p1914_p4 = scmp.ne.s32.totalorder %s2668_s13, 1 }
  0x93   : > { %v1888_v4 = vld [vmem:[%s343_s16] ss:$0 sm:$0xff]  ;;  %v467_v13 = vld [vmem:[#allocation2 + $0x10] sm:$0xff]  ;;  %v468_v19 = vld [vmem:[#allocation2 + $0x18] sm:$0xff] }
  0x94   : > { %v407_v3 = vshrl.u32 %v406_v1, 7  ;;  %v465_v15 = vld [vmem:[#allocation2] sm:$0xff]  ;;  %v470_v26 = vld [vmem:[#allocation2 + $0x28] sm:$0xff] }
  0x95   : > { %v471_v14 = vld [vmem:[#allocation2 + $0x30] sm:$0xff]  ;;  %v469_v16 = vld [vmem:[#allocation2 + $0x20] sm:$0xff]  ;;  %v472_v20 = vld [vmem:[#allocation2 + $0x38] sm:$0xff] }
  0x96   : > { %v408_v5 = vadd.s32 8, %v407_v3  ;;  %vm451_vm1 = vcmp.eq.s32.totalorder %v1897_v2, %v407_v3  ;;  %v409_v6 = vadd.s32 16, %v407_v3  ;;  %v410_v7 = vadd.s32 24, %v407_v3 }
  0x97   : > { %vm419_vm2 = vcmp.eq.s32.totalorder %v1888_v4, %v407_v3  ;;  %v411_v8 = vadd.s32 32, %v407_v3  ;;  %v412_v9 = vadd.s32 40, %v407_v3  ;;  %v413_v11 = vadd.s32 48, %v407_v3 }
  0x98   : > { %vm452_vm3 = vcmp.eq.s32.totalorder %v1897_v2, %v408_v5  ;;  %vm453_vm4 = vcmp.eq.s32.totalorder %v1897_v2, %v409_v6  ;;  %vm454_vm5 = vcmp.eq.s32.totalorder %v1897_v2, %v410_v7  ;;  %vm420_vm6 = vcmp.eq.s32.totalorder %v1888_v4, %v408_v5 }
  0x99   : > { %vm1902_vm7 = vmpackc.low %vm452_vm3, %vm451_vm1  ;;  %vm423_vm8 = vcmp.eq.s32.totalorder %v1888_v4, %v411_v8  ;;  %vm424_vm9 = vcmp.eq.s32.totalorder %v1888_v4, %v412_v9  ;;  %v414_v12 = vadd.s32 56, %v407_v3  ;;  %vm421_vm13 = vcmp.eq.s32.totalorder %v1888_v4, %v409_v6 }
  0x9a   : > { %2046 = vmatprep.subr.msk.bf16.mxu0 %vm1902_vm7, %v2594_v10  ;;  %2194 = vmatprep.subr.msk.bf16.mxu1 %vm1902_vm7, %v2594_v10  ;;  %vm1904_vm10 = vmpackc.low %vm454_vm5, %vm453_vm4  ;;  %vm422_vm14 = vcmp.eq.s32.totalorder %v1888_v4, %v410_v7  ;;  %vm425_vm15 = vcmp.eq.s32.totalorder %v1888_v4, %v413_v11 }
  0x9b   : > { %2047 = vmatpush3.bf16.xpose.msk.msra.mxu0 %vm1902_vm7, %v2594_v10  ;;  %2196 = vmatpush3.bf16.xpose.msk.msra.mxu1 %vm1902_vm7, %v2594_v10  ;;  %vm1906_vm11 = vmpackc.low %vm420_vm6, %vm419_vm2  ;;  %vm426_vm0 = vcmp.eq.s32.totalorder %v1888_v4, %v414_v12  ;;  %vm546_vm2 = vcmask 261120  }
  0x9c   : > { %2048 = vmatprep.subr.msk.bf16.mxu0 %vm1904_vm10, %v2594_v10  ;;  %2195 = vmatprep.subr.msk.bf16.mxu1 %vm1904_vm10, %v2594_v10  ;;  %vm1910_vm12 = vmpackc.low %vm424_vm9, %vm423_vm8 }
  0x9d   : > { %2050 = vmatprep.mubr.msk.bf16.mxu0 %vm1906_vm11, %v2594_v10  ;;  %2054 = vmatprep.mubr.msk.bf16.mxu1 %vm1910_vm12, %v2594_v10  ;;  %vm1908_vm1 = vmpackc.low %vm422_vm14, %vm421_vm13 }
  0x9e   : > { %vm1912_vm3 = vmpackc.low %vm426_vm0, %vm425_vm15 }
  0xa3   : > { %2049 = vmatpush3.bf16.xpose.msk.msra.mxu0 %vm1904_vm10, %v2594_v10  ;;  %2197 = vmatpush3.bf16.xpose.msk.msra.mxu1 %vm1904_vm10, %v2594_v10 }
  0xaa   : > { %2051 = vmatmul.mubr.msk.bf16.vlgmr.msra.gmra.mrb[0].mxu0 %vm1908_vm1, %v2594_v10  ;;  %2055 = vmatmul.mubr.msk.bf16.vlgmr.msra.gmra.mrb[0].mxu1 %vm1912_vm3, %v2594_v10 }
 0x17d   : > { %v2052_v17 = vpop.f32.mrb[0].mxu0  ;;  %v2056_v18 = vpop.f32.mrb[0].mxu1  ;;  %558 = sbr.rel (%p1914_p4) target bundleno = 3216 (0xc90), region = 76 }
 0x17e   : > { %v540_v21 = vadd.f32 %v2052_v17, %v467_v13  ;;  %v544_v22 = vadd.f32 %v2056_v18, %v471_v14  ;;  %v507_v23 = vpop.f32.mrb[1].mxu0  ;;  %v523_v24 = vpop.f32.mrb[1].mxu1 }
 0x17f   : > { %v538_v27 = vadd.f32 %v507_v23, %v465_v15  ;;  %v542_v28 = vadd.f32 %v523_v24, %v469_v16  ;;  %v2053_v29 = vpop.f32.mrb[2].mxu0  ;;  %v2057_v30 = vpop.f32.mrb[2].mxu1 }
 0x180   : > { %549 = vst.msk [vmem:[#allocation2 + $0x10] sm:$0xff] %vm546_vm2, %v540_v21  ;;  %553 = vst.msk [vmem:[#allocation2 + $0x30] sm:$0xff] %vm546_vm2, %v544_v22  ;;  %v541_v31 = vadd.f32 %v2053_v29, %v468_v19  ;;  %v545_v32 = vadd.f32 %v2057_v30, %v472_v20  ;;  %v510_v33 = vpop.f32.mrb[3].mxu0  ;;  %v526_v34 = vpop.f32.mrb[3].mxu1 }
 0x181   : > { %547 = vst.msk [vmem:[#allocation2] sm:$0xff] %vm546_vm2, %v538_v27  ;;  %551 = vst.msk [vmem:[#allocation2 + $0x20] sm:$0xff] %vm546_vm2, %v542_v28  ;;  %v539_v35 = vadd.f32 %v510_v33, %v466_v25  ;;  %v543_v36 = vadd.f32 %v526_v34, %v470_v26 }
 0x182   : > { %550 = vst.msk [vmem:[#allocation2 + $0x18] sm:$0xff] %vm546_vm2, %v541_v31  ;;  %554 = vst.msk [vmem:[#allocation2 + $0x38] sm:$0xff] %vm546_vm2, %v545_v32 }
 0x183   : > { %548 = vst.msk [vmem:[#allocation2 + $0x8] sm:$0xff] %vm546_vm2, %v539_v35  ;;  %552 = vst.msk [vmem:[#allocation2 + $0x28] sm:$0xff] %vm546_vm2, %v543_v36 }
 0x184   : > { %v2299_v37 = vld [vmem:[#allocation8] sm:$0xff]   ;;  %v2300_v38 = vld [vmem:[#allocation8 + $0x8] sm:$0xff]   ;;  %v2301_v39 = vld [vmem:[#allocation8 + $0x10] sm:$0xff]   ;;  %vm898_vm13 = vcmask 7168   ;;  %vm947_vm14 = vcmask 523264  }
 0x185   : > { %2058 = vmatprep.subr.bf16.mxu0 %v2299_v37  ;;  %v2302_v40 = vld [vmem:[#allocation8 + $0x18] sm:$0xff]   ;;  %v2843_v41 = vld [vmem:[#allocation6] sm:$0xff]  ;;  %v2845_v42 = vld [vmem:[#allocation6 + $0x8] sm:$0xff] }
 0x186   : > { %2059 = vmatpush3.bf16.msra.mxu0 %v2299_v37  ;;  %v672_v43 = vpack.c.bf16 %v2845_v42, %v2843_v41  ;;  %v2303_v49 = vld [vmem:[#allocation8 + $0x20] sm:$0xff]   ;;  %v2304_v55 = vld [vmem:[#allocation8 + $0x28] sm:$0xff]   ;;  %v2305_v56 = vld [vmem:[#allocation8 + $0x30] sm:$0xff]  }
 0x187   : > { %2060 = vmatprep.subr.bf16.mxu0 %v2300_v38  ;;  %v2853_v46 = vld [vmem:[#allocation2 + $0x10] sm:$0xff]  ;;  %v2306_v57 = vld [vmem:[#allocation8 + $0x38] sm:$0xff]   ;;  %v2873_v60 = vld [vmem:[#allocation6 + $0x20] sm:$0xff] }
 0x188   : > { %v2849_v44 = vld [vmem:[#allocation2] sm:$0xff]  ;;  %2074 = vmatprep.mubr.bf16.mxu0 %v672_v43  ;;  %v573_v50 = vsel %vm546_vm2, %v2853_v46, 0.0  ;;  %v2869_v58 = vld [vmem:[#allocation6 + $0x10] sm:$0xff]  ;;  %v2875_v61 = vld [vmem:[#allocation6 + $0x28] sm:$0xff] }
 0x189   : > { %v567_v45 = vsel %vm546_vm2, %v2849_v44, 0.0  ;;  %v2857_v48 = vld [vmem:[#allocation2 + $0x18] sm:$0xff]  ;;  %v2863_v52 = vld [vmem:[#allocation2 + $0x20] sm:$0xff]  ;;  %574 = vadd.xlane.f32.xlu1 %v573_v50  ;;  %v674_v63 = vpack.c.bf16 %v2875_v61, %v2873_v60  ;;  %v2891_v5 = vld [vmem:[#allocation2 + $0x30] sm:$0xff] }
 0x18a   : > { %2061 = vmatpush3.bf16.msra.mxu0 %v2300_v38  ;;  %v2855_v47 = vld [vmem:[#allocation2 + $0x8] sm:$0xff]  ;;  %568 = vadd.xlane.f32.xlu0 %v567_v45  ;;  %v576_v53 = vsel %vm546_vm2, %v2857_v48, 0.0  ;;  %v579_v54 = vsel %vm546_vm2, %v2863_v52, 0.0  ;;  %v2871_v59 = vld [vmem:[#allocation6 + $0x18] sm:$0xff]  ;;  %v2881_v0 = vld [vmem:[#allocation6 + $0x30] sm:$0xff]  ;;  %v585_v6 = vsel %vm546_vm2, %v2891_v5, 0.0 }
 0x18b   : > { %2062 = vmatprep.subr.bf16.mxu0 %v2301_v39  ;;  %v570_v51 = vsel %vm546_vm2, %v2855_v47, 0.0  ;;  %v673_v62 = vpack.c.bf16 %v2871_v59, %v2869_v58  ;;  %v2883_v1 = vld [vmem:[#allocation6 + $0x38] sm:$0xff]  ;;  %v2887_v3 = vld [vmem:[#allocation2 + $0x28] sm:$0xff] }
 0x18c   : > { %v675_v2 = vpack.c.bf16 %v2883_v1, %v2881_v0  ;;  %v582_v4 = vsel %vm546_vm2, %v2887_v3, 0.0  ;;  %v2895_v7 = vld [vmem:[#allocation2 + $0x38] sm:$0xff]  ;;  %v1915_v9 = vld [vmem:[%s3350_s4] ss:$0 sm:$0xff] }
 0x18d   : > { %577 = vadd.xlane.f32.xlu1 %v576_v53  ;;  %v588_v8 = vsel %vm546_vm2, %v2895_v7, 0.0  ;;  %v2909_v15 = vld [vmem:[%s3353_s7] ss:$0 sm:$0xff] }
 0x18e   : > { %2063 = vmatpush3.bf16.msra.mxu0 %v2301_v39  ;;  %571 = vadd.xlane.f32.xlu0 %v570_v51  ;;  %3389 = vst [vmem:[#allocation19_spill] sm:$0xff] %v2909_v15 }
 0x18f   : > { %2064 = vmatprep.subr.bf16.mxu0 %v2302_v40 }
 0x191   : > { %583 = vadd.xlane.f32.xlu1 %v582_v4 }
 0x192   : > { %2065 = vmatpush3.bf16.msra.mxu0 %v2302_v40  ;;  %580 = vadd.xlane.f32.xlu0 %v579_v54 }
 0x193   : > { %2066 = vmatprep.subr.bf16.mxu0 %v2303_v49 }
 0x195   : > { %589 = vadd.xlane.f32.xlu1 %v588_v8 }
 0x196   : > { %2067 = vmatpush3.bf16.msra.mxu0 %v2303_v49  ;;  %586 = vadd.xlane.f32.xlu0 %v585_v6 }
 0x197   : > { %2068 = vmatprep.subr.bf16.mxu0 %v2304_v55 }
 0x19a   : > { %2069 = vmatpush3.bf16.msra.mxu0 %v2304_v55 }
 0x19b   : > { %2070 = vmatprep.subr.bf16.mxu0 %v2305_v56 }
 0x19e   : > { %2071 = vmatpush3.bf16.msra.mxu0 %v2305_v56 }
 0x19f   : > { %2072 = vmatprep.subr.bf16.mxu0 %v2306_v57 }
 0x1a2   : > { %2073 = vmatpush3.bf16.msra.mxu0 %v2306_v57 }
 0x1a5   : > { %2075 = vmatmul.mubr.bf16.vlgmr.msra.gmra.mrb[0].mxu0 %v673_v62 }
 0x1a6   : > { %2078 = vmatprep.mubr.bf16.mxu0 %v674_v63 }
 0x1ad   : > { %2079 = vmatmul.mubr.bf16.gmra.mrb[4].mxu0 %v675_v2 }
 0x216   : > { %v2965_v50 = vpop.xlane.xlu1 %574 }
 0x217   : > { %v2963_v49 = vpop.xlane.xlu0 %568  ;;  %vm835_vm8 = vcmp.gt.f32.partialorder %v2965_v50, 0.0 }
 0x218   : > { %vm833_vm10 = vcmp.gt.f32.partialorder %v2963_v49, 0.0 }
 0x21a   : > { %v2969_v53 = vpop.xlane.xlu1 %577 }
 0x21b   : > { %v2967_v51 = vpop.xlane.xlu0 %571  ;;  %vm836_vm9 = vcmp.gt.f32.partialorder %v2969_v53, 0.0 }
 0x21c   : > { %vm834_vm5 = vcmp.gt.f32.partialorder %v2967_v51, 0.0 }
 0x21e   : > { %v2973_v55 = vpop.xlane.xlu1 %583 }
 0x21f   : > { %v2971_v54 = vpop.xlane.xlu0 %580  ;;  %vm838_vm4 = vcmp.gt.f32.partialorder %v2973_v55, 0.0 }
 0x220   : > { %vm837_vm6 = vcmp.gt.f32.partialorder %v2971_v54, 0.0 }
 0x222   : > { %v2977_v57 = vpop.xlane.xlu1 %589 }
 0x223   : > { %v2975_v56 = vpop.xlane.xlu0 %586  ;;  %vm840_vm11 = vcmp.gt.f32.partialorder %v2977_v57, 0.0 }
 0x224   : > { %vm839_vm7 = vcmp.gt.f32.partialorder %v2975_v56, 0.0 }
 0x278   : > { %v2076_v10 = vpop.f32.mrb[0].mxu0 }
 0x279   : > { %v2902_v11 = vadd.f32 %v2076_v10, %v1915_v9  ;;  %v764_v12 = vpop.f32.mrb[1].mxu0 }
 0x27a   : > { %v2904_v13 = vadd.f32 %v1915_v9, %v764_v12  ;;  %v2077_v14 = vpop.f32.mrb[2].mxu0 }
 0x27b   : > { %v3365_v16 = vmax.f32 %v2902_v11, 0.0  ;;  %v2912_v17 = vadd.f32 %v2077_v14, %v1915_v9  ;;  %v767_v18 = vpop.f32.mrb[3].mxu0 }
 0x27c   : > { %v2914_v19 = vadd.f32 %v1915_v9, %v767_v18  ;;  %v3367_v20 = vmax.f32 %v2904_v13, 0.0 }
 0x27d   : > { %v3364_v21 = vmax.f32 %v2912_v17, 0.0  ;;  %v811_v22 = vmul.f32 %v2909_v15, %v3365_v16 }
 0x27e   : > { %v3366_v23 = vmax.f32 %v2914_v19, 0.0  ;;  %v809_v27 = vmul.f32 %v2909_v15, %v3367_v20 }
 0x27f   : > { %821 = vadd.xlane.f32.xlu0 %v811_v22  ;;  %v812_v24 = vmul.f32 %v2909_v15, %v3364_v21 }
 0x280   : > { %v2080_v25 = vpop.f32.mrb[4].mxu0  ;;  %v810_v32 = vmul.f32 %v2909_v15, %v3366_v23 }
 0x281   : > { %v780_v26 = vpop.f32.mrb[5].mxu0  ;;  %823 = vadd.xlane.f32.xlu1 %v812_v24  ;;  %v2928_v28 = vadd.f32 %v2080_v25, %v1915_v9 }
 0x282   : > { %v2930_v29 = vadd.f32 %v1915_v9, %v780_v26  ;;  %v2081_v30 = vpop.f32.mrb[6].mxu0 }
 0x283   : > { %v783_v31 = vpop.f32.mrb[7].mxu0  ;;  %817 = vadd.xlane.f32.xlu0 %v809_v27  ;;  %v2936_v34 = vadd.f32 %v2081_v30, %v1915_v9  ;;  %v3361_v36 = vmax.f32 %v2928_v28, 0.0 }
 0x284   : > { %v3363_v33 = vmax.f32 %v2930_v29, 0.0  ;;  %v2938_v35 = vadd.f32 %v1915_v9, %v783_v31 }
 0x285   : > { %819 = vadd.xlane.f32.xlu1 %v810_v32  ;;  %v3360_v39 = vmax.f32 %v2936_v34, 0.0  ;;  %v815_v43 = vmul.f32 %v2909_v15, %v3361_v36 }
 0x286   : > { %v3362_v37 = vmax.f32 %v2938_v35, 0.0  ;;  %v813_v38 = vmul.f32 %v2909_v15, %v3363_v33 }
 0x287   : > { %v816_v45 = vmul.f32 %v2909_v15, %v3360_v39 }
 0x288   : > { %825 = vadd.xlane.f32.xlu0 %v813_v38  ;;  %v814_v40 = vmul.f32 %v2909_v15, %v3362_v37 }
 0x28a   : > { %827 = vadd.xlane.f32.xlu1 %v814_v40 }
 0x28c   : > { %829 = vadd.xlane.f32.xlu0 %v815_v43 }
 0x28e   : > { %831 = vadd.xlane.f32.xlu1 %v816_v45 }
 0x2c1   : > { %595 = vxpose.xlu1.b32.start [1/8] (short) (narrow) %v2849_v44, 32 }
 0x2c5   : > { %596 = vxpose.xlu1.b32.cont [2/8] (short) (narrow) %v2855_v47, 32 }
 0x2c9   : > { %597 = vxpose.xlu1.b32.cont [3/8] (short) (narrow) %v2853_v46, 32 }
 0x2cd   : > { %598 = vxpose.xlu1.b32.cont [4/8] (short) (narrow) %v2857_v48, 32 }
 0x2d1   : > { %599 = vxpose.xlu1.b32.cont [5/8] (short) (narrow) %v2863_v52, 32 }
 0x2d5   : > { %600 = vxpose.xlu1.b32.cont [6/8] (short) (narrow) %v2887_v3, 32 }
 0x2d9   : > { %601 = vxpose.xlu1.b32.cont [7/8] (short) (narrow) %v2891_v5, 32 }
 0x2dd   : > { %602 = vxpose.xlu1.b32.end [8/8] (short) (narrow) %v2895_v7, 32 }
 0x30c   : > { %v822_v62 = vpop.xlane.xlu0 %821 }
 0x30d   : > { %v843_v25 = vsel %vm835_vm8, %v822_v62, -inf }
 0x30e   : > { %v824_v63 = vpop.xlane.xlu1 %823 }
 0x30f   : > { %v844_v26 = vsel %vm836_vm9, %v824_v63, -inf }
 0x310   : > { %v818_v2 = vpop.xlane.xlu0 %817 }
 0x311   : > { %v841_v27 = vsel %vm833_vm10, %v818_v2, -inf }
 0x312   : > { %v820_v4 = vpop.xlane.xlu1 %819 }
 0x313   : > { %v842_v12 = vsel %vm834_vm5, %v820_v4, -inf }
 0x315   : > { %v826_v6 = vpop.xlane.xlu0 %825 }
 0x316   : > { %v845_v14 = vsel %vm837_vm6, %v826_v6, -inf }
 0x317   : > { %v828_v8 = vpop.xlane.xlu1 %827  ;;  %v849_v31 = vmax.f32 %v841_v27, %v845_v14 }
 0x318   : > { %v846_v9 = vsel %vm838_vm4, %v828_v8, -inf }
 0x319   : > { %v830_v10 = vpop.xlane.xlu0 %829  ;;  %v850_v22 = vmax.f32 %v842_v12, %v846_v9 }
 0x31a   : > { %v847_v18 = vsel %vm839_vm7, %v830_v10, -inf }
 0x31b   : > { %v832_v24 = vpop.xlane.xlu1 %831  ;;  %v851_v32 = vmax.f32 %v843_v25, %v847_v18  ;;  %v853_v40 = vmax.f32 %v849_v31, %v850_v22 }
 0x31c   : > { %v848_v30 = vsel %vm840_vm11, %v832_v24, -inf }
 0x31d   : > { %v852_v38 = vmax.f32 %v844_v26, %v848_v30 }
 0x31f   : > { %v854_v43 = vmax.f32 %v851_v32, %v852_v38 }
 0x321   : > { %v855_v45 = vmax.f32 %v853_v40, %v854_v43 }
 0x323   : > { %v856_v9 = vrot.slane %v855_v45, 4 }
 0x325   : > { %v857_v12 = vmax.f32 %v855_v45, %v856_v9 }
 0x327   : > { %v858_v39 = vrot.slane %v857_v12, 2 }
 0x329   : > { %v859_v36 = vmax.f32 %v857_v12, %v858_v39 }
 0x32b   : > { %v860_v37 = vrot.slane %v859_v36, 1 }
 0x32d   : > { %v861_v33 = vmax.f32 %v859_v36, %v860_v37 }
 0x32f   : > { %2198 = vpush %v861_v33 }
 0x360   : > { %s2199_s19 = spop %2198 }
 0x361   : > { %v863_v21 = vstv %s2199_s19 }
 0x362   : > { %vm864_vm12 = vcmp.gt.f32.partialorder %v863_v21, -inf }
 0x363   : > { %v865_v16 = vsel %vm864_vm12, %v863_v21, 0.0 }
 0x364   : > { %v866_v23 = vsub.f32 %v818_v2, %v865_v16  ;;  %v867_v20 = vsub.f32 %v820_v4, %v865_v16  ;;  %v868_v15 = vsub.f32 %v822_v62, %v865_v16  ;;  %v869_v14 = vsub.f32 %v824_v63, %v865_v16 }
 0x365   : > { %v870_v18 = vsub.f32 %v826_v6, %v865_v16  ;;  %v871_v25 = vsub.f32 %v828_v8, %v865_v16  ;;  %v872_v30 = vsub.f32 %v830_v10, %v865_v16  ;;  %v873_v33 = vsub.f32 %v832_v24, %v865_v16 }
 0x366   : > { %v874_v22 = vmul.f32 1.442695, %v866_v23  ;;  %v876_v26 = vmul.f32 1.442695, %v867_v20  ;;  %v878_v27 = vmul.f32 1.442695, %v868_v15 }
 0x367   : > { %v880_v31 = vmul.f32 1.442695, %v869_v14  ;;  %v882_v39 = vmul.f32 1.442695, %v870_v18  ;;  %v884_v36 = vmul.f32 1.442695, %v871_v25 }
 0x368   : > { %2331 = vpow2.f32 %v874_v22  ;;  %v886_v37 = vmul.f32 1.442695, %v872_v30  ;;  %v888_v21 = vmul.f32 1.442695, %v873_v33 }
 0x369   : > { %2333 = vpow2.f32 %v876_v26 }
 0x36a   : > { %2335 = vpow2.f32 %v878_v27 }
 0x36b   : > { %2337 = vpow2.f32 %v880_v31 }
 0x36c   : > { %2339 = vpow2.f32 %v882_v39 }
 0x36d   : > { %2341 = vpow2.f32 %v884_v36 }
 0x36e   : > { %2343 = vpow2.f32 %v886_v37 }
 0x36f   : > { %2345 = vpow2.f32 %v888_v21  ;;  %v611_v21 = vpop.trf.xlu1 }
 0x372   : > { %v2332_v62 = vpop.eup %2331 }
 0x373   : > { %v2334_v23 = vpop.eup %2333  ;;  %v890_v15 = vmul.f32 %v2332_v62, %v2963_v49 }
 0x374   : > { %v2336_v20 = vpop.eup %2335  ;;  %v891_v63 = vmul.f32 %v2334_v23, %v2967_v51 }
 0x375   : > { %v2338_v2 = vpop.eup %2337  ;;  %v892_v4 = vmul.f32 %v2336_v20, %v2965_v50  ;;  %v899_v16 = vsel %vm898_vm13, %v890_v15, 0.0  ;;  %v612_v15 = vpop.trf.xlu1 }
 0x376   : > { %v2340_v6 = vpop.eup %2339  ;;  %v893_v8 = vmul.f32 %v2338_v2, %v2969_v53  ;;  %v900_v10 = vsel %vm898_vm13, %v891_v63, 0.0  ;;  %v3019_v63 = vpack.c.bf16 %v612_v15, %v611_v21 }
 0x377   : > { %v2342_v24 = vpop.eup %2341  ;;  %v901_v32 = vadd.f32 %v900_v10, %v899_v16  ;;  %v894_v38 = vmul.f32 %v2340_v6, %v2971_v54  ;;  %v902_v40 = vsel %vm898_vm13, %v892_v4, 0.0 }
 0x378   : > { %v2344_v43 = vpop.eup %2343  ;;  %v895_v9 = vmul.f32 %v2342_v24, %v2973_v55  ;;  %v904_v12 = vsel %vm898_vm13, %v893_v8, 0.0  ;;  %2090 = vmatprep.mubr.msk.bf16.mxu1 %vm947_vm14, %v3019_v63 }
 0x379   : > { %v903_v45 = vadd.f32 %v902_v40, %v901_v32  ;;  %v2346_v14 = vpop.eup %2345  ;;  %v896_v25 = vmul.f32 %v2344_v43, %v2975_v56  ;;  %v906_v22 = vsel %vm898_vm13, %v894_v38, 0.0 }
 0x37a   : > { %v897_v27 = vmul.f32 %v2346_v14, %v2977_v57  ;;  %v908_v30 = vsel %vm898_vm13, %v895_v9, 0.0 }
 0x37b   : > { %v905_v18 = vadd.f32 %v904_v12, %v903_v45  ;;  %v910_v39 = vsel %vm898_vm13, %v896_v25, 0.0 }
 0x37c   : > { %v912_v33 = vsel %vm898_vm13, %v897_v27, 0.0 }
 0x37d   : > { %v907_v26 = vadd.f32 %v906_v22, %v905_v18 }
 0x37f   : > { %v909_v31 = vadd.f32 %v908_v30, %v907_v26 }
 0x381   : > { %v911_v36 = vadd.f32 %v910_v39, %v909_v31  ;;  %v3390_v31 = vmax.f32 %v2904_v13, 0.0  ;;  %v3394_v13 = vmax.f32 %v2930_v29, 0.0  ;;  %v613_v29 = vpop.trf.xlu1 }
 0x383   : > { %v913_v37 = vadd.f32 %v912_v33, %v911_v36  ;;  %v3391_v36 = vmax.f32 %v2914_v19, 0.0  ;;  %v3395_v19 = vmax.f32 %v2938_v35, 0.0  ;;  %v2307_v35 = vld [vmem:[#allocation9] sm:$0xff]  }
 0x385   : > { %914 = vadd.xlane.f32.xlu0 %v913_v37 }
 0x412   : > { %v915_v4 = vpop.xlane.xlu0 %914 }
 0x413   : > { %v916_v16 = vrot.slane %v915_v4, 4 }
 0x415   : > { %v917_v8 = vadd.f32 %v916_v16, %v915_v4  ;;  %v3396_v4 = vmax.f32 %v2928_v28, 0.0  ;;  %v3397_v16 = vmax.f32 %v2936_v34, 0.0  ;;  %v2309_v28 = vld [vmem:[#allocation9 + $0x10] sm:$0xff]   ;;  %v2310_v34 = vld [vmem:[#allocation9 + $0x18] sm:$0xff]  }
 0x417   : > { %v918_v10 = vrot.slane %v917_v8, 2 }
 0x419   : > { %v919_v32 = vadd.f32 %v918_v10, %v917_v8 }
 0x41b   : > { %v920_v38 = vrot.slane %v919_v32, 1 }
 0x41d   : > { %v921_v40 = vadd.f32 %v920_v38, %v919_v32  ;;  %v2308_v38 = vld [vmem:[#allocation9 + $0x8] sm:$0xff]  }
 0x41f   : > { %2200 = vpush %v921_v40  ;;  %v2311_v40 = vld [vmem:[#allocation9 + $0x20] sm:$0xff]  }
 0x450   : > { %s2201_s21 = spop %2200 }
 0x451   : > { %v923_v45 = vstv %s2201_s21 }
 0x452   : > { %2347 = vrcp.f32 %v923_v45  ;;  %vm924_vm15 = vcmp.gt.f32.partialorder %v923_v45, 0.0  ;;  %v2312_v45 = vld [vmem:[#allocation9 + $0x28] sm:$0xff]  }
 0x45c   : > { %v2348_v9 = vpop.eup %2347 }
 0x45d   : > { %v926_v12 = vsel %vm924_vm15, %v2348_v9, 0.0  ;;  %v2313_v9 = vld [vmem:[#allocation9 + $0x30] sm:$0xff]  }
 0x45e   : > { %v3023_v18 = vmul.f32 %v2332_v62, %v926_v12  ;;  %v3025_v25 = vmul.f32 %v2334_v23, %v926_v12  ;;  %v3027_v22 = vmul.f32 %v2336_v20, %v926_v12  ;;  %v3029_v26 = vmul.f32 %v2338_v2, %v926_v12 }
 0x45f   : > { %v3031_v27 = vmul.f32 %v2340_v6, %v926_v12  ;;  %v3033_v30 = vmul.f32 %v2342_v24, %v926_v12  ;;  %v3392_v62 = vmax.f32 %v2902_v11, 0.0  ;;  %v3393_v20 = vmax.f32 %v2912_v17, 0.0 }
 0x460   : > { %v935_v39 = vmul.f32 %v3023_v18, %v3390_v31  ;;  %v936_v33 = vmul.f32 %v3025_v25, %v3391_v36  ;;  %v3047_v37 = vmul.f32 %v2344_v43, %v926_v12  ;;  %v3055_v11 = vmul.f32 %v2346_v14, %v926_v12  ;;  %v614_v14 = vpop.trf.xlu1  ;;  %v2314_v12 = vld [vmem:[#allocation9 + $0x38] sm:$0xff]  }
 0x461   : > { %v937_v23 = vmul.f32 %v3027_v22, %v3392_v62  ;;  %v938_v2 = vmul.f32 %v3029_v26, %v3393_v20  ;;  %v939_v21 = vmul.f32 %v3031_v27, %v3394_v13  ;;  %v940_v15 = vmul.f32 %v3033_v30, %v3395_v19 }
 0x462   : > { %v943_v6 = vpack.c.bf16 %v936_v33, %v935_v39  ;;  %v941_v43 = vmul.f32 %v3047_v37, %v3396_v4  ;;  %v942_v8 = vmul.f32 %v3055_v11, %v3397_v16  ;;  %v3063_v32 = vpack.c.bf16 %v614_v14, %v613_v29  ;;  %v2315_v29 = vld [vmem:[#allocation8 + $0x40] sm:$0xff]   ;;  %v2316_v14 = vld [vmem:[#allocation8 + $0x48] sm:$0xff]  }
 0x463   : > { %v944_v24 = vpack.c.bf16 %v938_v2, %v937_v23  ;;  %v945_v17 = vpack.c.bf16 %v940_v15, %v939_v21  ;;  %v3071_v20 = vpack.c.bf16 %v2855_v47, %v2849_v44  ;;  %v1927_v2 = vld [vmem:[%s3352_s6] ss:$0 sm:$0xff] }
 0x464   : > { %2082 = vmatprep.subr.bf16.mxu1 %v943_v6  ;;  %v946_v10 = vpack.c.bf16 %v942_v8, %v941_v43 }
 0x465   : > { %2083 = vmatpush3.bf16.msra.mxu1 %v943_v6  ;;  %2118 = vmatprep.mubr.msk.bf16.mxu0 %vm546_vm2, %v3071_v20 }
 0x466   : > { %2084 = vmatprep.subr.bf16.mxu1 %v944_v24 }
 0x469   : > { %2085 = vmatpush3.bf16.msra.mxu1 %v944_v24 }
 0x46a   : > { %2086 = vmatprep.subr.bf16.mxu1 %v945_v17 }
 0x46d   : > { %2087 = vmatpush3.bf16.msra.mxu1 %v945_v17 }
 0x46e   : > { %2088 = vmatprep.subr.bf16.mxu1 %v946_v10 }
 0x471   : > { %2089 = vmatpush3.bf16.msra.mxu1 %v946_v10  ;;  %v3080_v10 = vpack.c.bf16 %v2857_v48, %v2853_v46  ;;  %v3092_v46 = vpack.c.bf16 %v2895_v7, %v2891_v5  ;;  %v2318_v48 = vld [vmem:[#allocation8 + $0x58] sm:$0xff]  }
 0x472   : > { %2094 = vmatprep.subr.bf16.mxu1 %v2307_v35 }
 0x474   : > { %2091 = vmatmul.mubr.msk.bf16.vlgmr.msra.gmra.mrb[0].mxu1 %vm947_vm14, %v3063_v32 }
 0x475   : > { %2095 = vmatpush3.bf16.msra.mxu1 %v2307_v35  ;;  %v3084_v35 = vpack.c.bf16 %v2887_v3, %v2863_v52  ;;  %v2319_v52 = vld [vmem:[#allocation8 + $0x60] sm:$0xff]   ;;  %v2320_v3 = vld [vmem:[#allocation8 + $0x68] sm:$0xff]  }
 0x476   : > { %2096 = vmatprep.subr.bf16.mxu1 %v2308_v38 }
 0x479   : > { %2097 = vmatpush3.bf16.msra.mxu1 %v2308_v38  ;;  %v2317_v38 = vld [vmem:[#allocation8 + $0x50] sm:$0xff]  }
 0x47a   : > { %2098 = vmatprep.subr.bf16.mxu1 %v2309_v28 }
 0x47d   : > { %2099 = vmatpush3.bf16.msra.mxu1 %v2309_v28  ;;  %v2321_v28 = vld [vmem:[#allocation8 + $0x70] sm:$0xff]  }
 0x47e   : > { %2100 = vmatprep.subr.bf16.mxu1 %v2310_v34 }
 0x481   : > { %2101 = vmatpush3.bf16.msra.mxu1 %v2310_v34  ;;  %v2322_v34 = vld [vmem:[#allocation8 + $0x78] sm:$0xff]  }
 0x482   : > { %2102 = vmatprep.subr.bf16.mxu1 %v2311_v40 }
 0x485   : > { %2103 = vmatpush3.bf16.msra.mxu1 %v2311_v40 }
 0x486   : > { %2104 = vmatprep.subr.bf16.mxu1 %v2312_v45 }
 0x489   : > { %2105 = vmatpush3.bf16.msra.mxu1 %v2312_v45 }
 0x48a   : > { %2106 = vmatprep.subr.bf16.mxu1 %v2313_v9 }
 0x48d   : > { %2107 = vmatpush3.bf16.msra.mxu1 %v2313_v9 }
 0x48e   : > { %2108 = vmatprep.subr.bf16.mxu1 %v2314_v12 }
 0x491   : > { %2109 = vmatpush3.bf16.msra.mxu1 %v2314_v12 }
 0x547   : > { %v2092_v31 = vpop.f32.mrb[0].mxu1 }
 0x548   : > { %v988_v39 = vpop.f32.mrb[1].mxu1 }
 0x549   : > { %v2093_v36 = vpop.f32.mrb[2].mxu1 }
 0x54a   : > { %v1004_v33 = vpack.c.bf16 %v2093_v36, %v2092_v31  ;;  %v991_v62 = vpop.f32.mrb[3].mxu1 }
 0x54b   : > { %v1003_v23 = vpack.c.bf16 %v991_v62, %v988_v39 }
 0x54d   : > { %2110 = vmatprep.mubr.bf16.mxu1 %v1003_v23 }
 0x54e   : > { %2111 = vmatmul.mubr.bf16.vlgmr.msra.gmra.mrb[4].mxu1 %v1004_v33 }
 0x54f   : > { %2158 = vmatprep.mubr.msk.bf16.mxu1 %vm947_vm14, %v3019_v63 }
 0x621   : > { %v2112_v6 = vpop.f32.mrb[4].mxu1 }
 0x622   : > { %v1102_v24 = vadd.f32 %v2112_v6, %v1927_v2  ;;  %v1093_v13 = vpop.f32.mrb[5].mxu1 }
 0x623   : > { %v1094_v21 = vadd.f32 %v1927_v2, %v1093_v13  ;;  %v2113_v19 = vpop.f32.mrb[6].mxu1 }
 0x624   : > { %v1105_v15 = vadd.f32 %v2113_v19, %v1927_v2  ;;  %v1096_v17 = vpop.f32.mrb[7].mxu1  ;;  %v1110_v63 = vmax.f32 %v1102_v24, 0.0 }
 0x625   : > { %v1097_v4 = vadd.f32 %v1927_v2, %v1096_v17  ;;  %v1108_v16 = vmax.f32 %v1094_v21, 0.0 }
 0x626   : > { %v1111_v43 = vmax.f32 %v1105_v15, 0.0 }
 0x627   : > { %v1109_v44 = vmax.f32 %v1097_v4, 0.0 }
 0x628   : > { %v1113_v47 = vpack.c.bf16 %v1111_v43, %v1110_v63 }
 0x629   : > { %v1112_v8 = vpack.c.bf16 %v1109_v44, %v1108_v16 }
 0x62b   : > { %2114 = vmatprep.subr.bf16.mxu0 %v1112_v8 }
 0x62c   : > { %2115 = vmatpush3.bf16.msra.mxu0 %v1112_v8 }
 0x62d   : > { %2116 = vmatprep.subr.bf16.mxu0 %v1113_v47 }
 0x630   : > { %2117 = vmatpush3.bf16.msra.mxu0 %v1113_v47 }
 0x631   : > { %2126 = vmatprep.subr.bf16.mxu0 %v2315_v29 }
 0x633   : > { %2119 = vmatmul.mubr.msk.bf16.vlgmr.msra.gmra.mrb[8].mxu0 %vm546_vm2, %v3080_v10 }
 0x634   : > { %2122 = vmatprep.mubr.msk.bf16.mxu0 %vm546_vm2, %v3084_v35  ;;  %2127 = vmatpush3.bf16.msra.mxu0 %v2315_v29 }
 0x635   : > { %2128 = vmatprep.subr.bf16.mxu0 %v2316_v14 }
 0x638   : > { %2129 = vmatpush3.bf16.msra.mxu0 %v2316_v14 }
 0x639   : > { %2130 = vmatprep.subr.bf16.mxu0 %v2317_v38 }
 0x63b   : > { %2123 = vmatmul.mubr.msk.bf16.gmra.mrb[12].mxu0 %vm546_vm2, %v3092_v46 }
 0x63c   : > { %2131 = vmatpush3.bf16.msra.mxu0 %v2317_v38 }
 0x63d   : > { %2132 = vmatprep.subr.bf16.mxu0 %v2318_v48 }
 0x640   : > { %2133 = vmatpush3.bf16.msra.mxu0 %v2318_v48 }
 0x641   : > { %2134 = vmatprep.subr.bf16.mxu0 %v2319_v52 }
 0x644   : > { %2135 = vmatpush3.bf16.msra.mxu0 %v2319_v52 }
 0x645   : > { %2136 = vmatprep.subr.bf16.mxu0 %v2320_v3 }
 0x648   : > { %2137 = vmatpush3.bf16.msra.mxu0 %v2320_v3 }
 0x649   : > { %2138 = vmatprep.subr.bf16.mxu0 %v2321_v28 }
 0x64c   : > { %2139 = vmatpush3.bf16.msra.mxu0 %v2321_v28 }
 0x64d   : > { %2140 = vmatprep.subr.bf16.mxu0 %v2322_v34 }
 0x650   : > { %2141 = vmatpush3.bf16.msra.mxu0 %v2322_v34 }
 0x706   : > { %v2120_v5 = vpop.f32.mrb[8].mxu0 }
 0x707   : > { %v1160_v7 = vpop.f32.mrb[9].mxu0  ;;  %v1193_v9 = vmul.f32 %v2120_v5, %v3027_v22 }
 0x708   : > { %v1191_v40 = vmul.f32 %v1160_v7, %v3023_v18  ;;  %v2121_v45 = vpop.f32.mrb[10].mxu0 }
 0x709   : > { %v1194_v12 = vmul.f32 %v2121_v45, %v3029_v26  ;;  %v1163_v31 = vpop.f32.mrb[11].mxu0  ;;  %v3110_v23 = vadd.f32 %v1193_v9, %v2869_v58 }
 0x70a   : > { %v1192_v39 = vmul.f32 %v1163_v31, %v3025_v25  ;;  %v3104_v33 = vadd.f32 %v1191_v40, %v2843_v41 }
 0x70b   : > { %v3101_v36 = vadd.f32 %v1194_v12, %v2871_v59 }
 0x70c   : > { %v3107_v62 = vadd.f32 %v1192_v39, %v2845_v42 }
 0x70d   : > { %v1246_v26 = vpack.c.bf16 %v3101_v36, %v3110_v23 }
 0x70e   : > { %v2124_v18 = vpop.f32.mrb[12].mxu0  ;;  %v1245_v22 = vpack.c.bf16 %v3107_v62, %v3104_v33 }
 0x70f   : > { %v1176_v25 = vpop.f32.mrb[13].mxu0  ;;  %v1197_v41 = vmul.f32 %v2124_v18, %v3047_v37 }
 0x710   : > { %v1195_v59 = vmul.f32 %v1176_v25, %v3031_v27  ;;  %v2125_v2 = vpop.f32.mrb[14].mxu0  ;;  %2142 = vmatprep.mubr.bf16.mxu0 %v1245_v22 }
 0x711   : > { %v1198_v42 = vmul.f32 %v2125_v2, %v3055_v11  ;;  %v1179_v6 = vpop.f32.mrb[15].mxu0  ;;  %2143 = vmatmul.mubr.bf16.vlgmr.msra.gmra.mrb[16].mxu0 %v1246_v26  ;;  %v3130_v27 = vadd.f32 %v1197_v41, %v2881_v0 }
 0x712   : > { %v1196_v58 = vmul.f32 %v1179_v6, %v3033_v30  ;;  %v3124_v13 = vadd.f32 %v1195_v59, %v2873_v60  ;;  %v1942_v60 = vld [vmem:[%s3350_s4 + $0x1] ss:$0 sm:$0xff] }
 0x713   : > { %v3121_v24 = vadd.f32 %v1198_v42, %v2883_v1 }
 0x714   : > { %v3127_v21 = vadd.f32 %v1196_v58, %v2875_v61 }
 0x715   : > { %v1248_v11 = vpack.c.bf16 %v3121_v24, %v3130_v27 }
 0x716   : > { %v1247_v37 = vpack.c.bf16 %v3127_v21, %v3124_v13 }
 0x718   : > { %2146 = vmatprep.mubr.bf16.mxu0 %v1247_v37 }
 0x719   : > { %2147 = vmatmul.mubr.bf16.gmra.mrb[20].mxu0 %v1248_v11 }
 0x71a   : > { %2186 = vmatprep.mubr.msk.bf16.mxu0 %vm546_vm2, %v3071_v20  ;;  %v3398_v20 = vld [vmem:[#allocation19_spill] sm:$0xff] }
 0x7e4   : > { %v2144_v61 = vpop.f32.mrb[16].mxu0 }
 0x7e5   : > { %v3141_v1 = vadd.f32 %v2144_v61, %v1942_v60  ;;  %v1337_v0 = vpop.f32.mrb[17].mxu0 }
 0x7e6   : > { %v3143_v30 = vadd.f32 %v1942_v60, %v1337_v0  ;;  %v2145_v19 = vpop.f32.mrb[18].mxu0 }
 0x7e7   : > { %v1370_v15 = vmax.f32 %v3141_v1, 0.0  ;;  %v1340_v17 = vpop.f32.mrb[19].mxu0  ;;  %v3147_v63 = vadd.f32 %v2145_v19, %v1942_v60 }
 0x7e8   : > { %v1368_v4 = vmax.f32 %v3143_v30, 0.0  ;;  %v3153_v47 = vadd.f32 %v1942_v60, %v1340_v17 }
 0x7e9   : > { %v1378_v43 = vmul.f32 %v3398_v20, %v1370_v15  ;;  %v1371_v44 = vmax.f32 %v3147_v63, 0.0 }
 0x7ea   : > { %v1376_v29 = vmul.f32 %v3398_v20, %v1368_v4  ;;  %v1369_v48 = vmax.f32 %v3153_v47, 0.0 }
 0x7eb   : > { %1388 = vadd.xlane.f32.xlu0 %v1378_v43  ;;  %v1379_v3 = vmul.f32 %v3398_v20, %v1371_v44 }
 0x7ec   : > { %v2148_v16 = vpop.f32.mrb[20].mxu0  ;;  %v1377_v5 = vmul.f32 %v3398_v20, %v1369_v48 }
 0x7ed   : > { %v1353_v8 = vpop.f32.mrb[21].mxu0  ;;  %v3159_v52 = vadd.f32 %v2148_v16, %v1942_v60 }
 0x7ee   : > { %v2149_v14 = vpop.f32.mrb[22].mxu0  ;;  %v3165_v34 = vadd.f32 %v1942_v60, %v1353_v8 }
 0x7ef   : > { %1384 = vadd.xlane.f32.xlu0 %v1376_v29  ;;  %v1356_v38 = vpop.f32.mrb[23].mxu0  ;;  %v3371_v28 = vmax.f32 %v3159_v52, 0.0  ;;  %v3176_v9 = vadd.f32 %v2149_v14, %v1942_v60  ;;  %v3401_v63 = vmax.f32 %v3159_v52, 0.0  ;;  %v2325_v52 = vld [vmem:[#allocation9 + $0x50] sm:$0xff]  }
 0x7f0   : > { %v3373_v7 = vmax.f32 %v3165_v34, 0.0  ;;  %v3171_v40 = vadd.f32 %v1942_v60, %v1356_v38  ;;  %v3399_v30 = vmax.f32 %v3165_v34, 0.0 }
 0x7f1   : > { %v1382_v45 = vmul.f32 %v3398_v20, %v3371_v28  ;;  %v3370_v39 = vmax.f32 %v3176_v9, 0.0 }
 0x7f2   : > { %v3372_v12 = vmax.f32 %v3171_v40, 0.0  ;;  %v1380_v31 = vmul.f32 %v3398_v20, %v3373_v7  ;;  %v3400_v47 = vmax.f32 %v3171_v40, 0.0  ;;  %v2323_v40 = vld [vmem:[#allocation9 + $0x40] sm:$0xff]  }
 0x7f3   : > { %1390 = vadd.xlane.f32.xlu0 %v1379_v3  ;;  %v1383_v22 = vmul.f32 %v3398_v20, %v3370_v39 }
 0x7f4   : > { %v1381_v18 = vmul.f32 %v3398_v20, %v3372_v12 }
 0x7f7   : > { %1386 = vadd.xlane.f32.xlu0 %v1377_v5 }
 0x7fb   : > { %1396 = vadd.xlane.f32.xlu0 %v1382_v45 }
 0x7ff   : > { %1392 = vadd.xlane.f32.xlu0 %v1380_v31 }
 0x803   : > { %1394 = vadd.xlane.f32.xlu0 %v1381_v18 }
 0x807   : > { %1398 = vadd.xlane.f32.xlu0 %v1383_v22 }
 0x878   : > { %v1389_v26 = vpop.xlane.xlu0 %1388 }
 0x879   : > { %v1402_v19 = vsel %vm835_vm8, %v1389_v26, -inf }
 0x87c   : > { %v1385_v25 = vpop.xlane.xlu0 %1384 }
 0x87d   : > { %v1400_v17 = vsel %vm833_vm10, %v1385_v25, -inf }
 0x880   : > { %v1391_v59 = vpop.xlane.xlu0 %1390 }
 0x881   : > { %v1403_v20 = vsel %vm836_vm9, %v1391_v59, -inf }
 0x884   : > { %v1387_v2 = vpop.xlane.xlu0 %1386 }
 0x885   : > { %v1401_v37 = vsel %vm834_vm5, %v1387_v2, -inf }
 0x888   : > { %v1397_v41 = vpop.xlane.xlu0 %1396 }
 0x889   : > { %v1406_v11 = vsel %vm839_vm7, %v1397_v41, -inf }
 0x88a   : > { %v1410_v16 = vmax.f32 %v1402_v19, %v1406_v11 }
 0x88c   : > { %v1393_v42 = vpop.xlane.xlu0 %1392 }
 0x88d   : > { %v1404_v60 = vsel %vm837_vm6, %v1393_v42, -inf }
 0x88e   : > { %v1408_v8 = vmax.f32 %v1400_v17, %v1404_v60 }
 0x890   : > { %v1395_v6 = vpop.xlane.xlu0 %1394 }
 0x891   : > { %v1405_v58 = vsel %vm838_vm4, %v1395_v6, -inf }
 0x892   : > { %v1409_v61 = vmax.f32 %v1401_v37, %v1405_v58 }
 0x894   : > { %v1399_v0 = vpop.xlane.xlu0 %1398  ;;  %v1412_v14 = vmax.f32 %v1408_v8, %v1409_v61 }
 0x895   : > { %v1407_v43 = vsel %vm840_vm11, %v1399_v0, -inf }
 0x896   : > { %v1411_v29 = vmax.f32 %v1403_v20, %v1407_v43 }
 0x898   : > { %v1413_v38 = vmax.f32 %v1410_v16, %v1411_v29 }
 0x89a   : > { %v1414_v3 = vmax.f32 %v1412_v14, %v1413_v38 }
 0x89c   : > { %v1415_v5 = vrot.slane %v1414_v3, 4 }
 0x89e   : > { %v1416_v45 = vmax.f32 %v1414_v3, %v1415_v5 }
 0x8a0   : > { %v1417_v31 = vrot.slane %v1416_v45, 2 }
 0x8a2   : > { %v1418_v18 = vmax.f32 %v1416_v45, %v1417_v31 }
 0x8a4   : > { %v1419_v22 = vrot.slane %v1418_v18, 1 }
 0x8a6   : > { %v1420_v58 = vmax.f32 %v1418_v18, %v1419_v22 }
 0x8a8   : > { %2202 = vpush %v1420_v58 }
 0x8d9   : > { %s2203_s25 = spop %2202 }
 0x8da   : > { %v1422_v37 = vstv %s2203_s25 }
 0x8db   : > { %vm1423_vm0 = vcmp.gt.f32.partialorder %v1422_v37, -inf }
 0x8dc   : > { %v1424_v39 = vsel %vm1423_vm0, %v1422_v37, 0.0 }
 0x8dd   : > { %v1425_v28 = vsub.f32 %v1385_v25, %v1424_v39  ;;  %v1426_v12 = vsub.f32 %v1387_v2, %v1424_v39  ;;  %v1427_v7 = vsub.f32 %v1389_v26, %v1424_v39  ;;  %v1428_v11 = vsub.f32 %v1391_v59, %v1424_v39 }
 0x8de   : > { %v1429_v60 = vsub.f32 %v1393_v42, %v1424_v39  ;;  %v1430_v19 = vsub.f32 %v1395_v6, %v1424_v39  ;;  %v1431_v43 = vsub.f32 %v1397_v41, %v1424_v39  ;;  %v1432_v14 = vsub.f32 %v1399_v0, %v1424_v39 }
 0x8df   : > { %v1433_v61 = vmul.f32 1.442695, %v1425_v28  ;;  %v1435_v17 = vmul.f32 1.442695, %v1426_v12  ;;  %v1437_v20 = vmul.f32 1.442695, %v1427_v7 }
 0x8e0   : > { %v1439_v16 = vmul.f32 1.442695, %v1428_v11  ;;  %v1441_v8 = vmul.f32 1.442695, %v1429_v60  ;;  %v1443_v29 = vmul.f32 1.442695, %v1430_v19 }
 0x8e1   : > { %2349 = vpow2.f32 %v1433_v61  ;;  %v1445_v38 = vmul.f32 1.442695, %v1431_v43  ;;  %v1447_v25 = vmul.f32 1.442695, %v1432_v14 }
 0x8e2   : > { %2351 = vpow2.f32 %v1435_v17 }
 0x8e3   : > { %2353 = vpow2.f32 %v1437_v20 }
 0x8e4   : > { %2355 = vpow2.f32 %v1439_v16 }
 0x8e5   : > { %2357 = vpow2.f32 %v1441_v8 }
 0x8e6   : > { %2359 = vpow2.f32 %v1443_v29 }
 0x8e7   : > { %2361 = vpow2.f32 %v1445_v38 }
 0x8e8   : > { %2363 = vpow2.f32 %v1447_v25 }
 0x8eb   : > { %v2350_v26 = vpop.eup %2349 }
 0x8ec   : > { %v2352_v59 = vpop.eup %2351  ;;  %v1449_v28 = vmul.f32 %v2350_v26, %v2963_v49 }
 0x8ed   : > { %v2354_v7 = vpop.eup %2353  ;;  %v1450_v12 = vmul.f32 %v2352_v59, %v2967_v51 }
 0x8ee   : > { %v2356_v2 = vpop.eup %2355  ;;  %v1451_v41 = vmul.f32 %v2354_v7, %v2965_v50  ;;  %v1457_v39 = vsel %vm898_vm13, %v1449_v28, 0.0 }
 0x8ef   : > { %v2358_v42 = vpop.eup %2357  ;;  %v1452_v6 = vmul.f32 %v2356_v2, %v2969_v53  ;;  %v1458_v0 = vsel %vm898_vm13, %v1450_v12, 0.0 }
 0x8f0   : > { %v2360_v3 = vpop.eup %2359  ;;  %v1459_v5 = vadd.f32 %v1458_v0, %v1457_v39  ;;  %v1453_v45 = vmul.f32 %v2358_v42, %v2971_v54  ;;  %v1460_v31 = vsel %vm898_vm13, %v1451_v41, 0.0 }
 0x8f1   : > { %v2362_v49 = vpop.eup %2361  ;;  %v1454_v51 = vmul.f32 %v2360_v3, %v2973_v55  ;;  %v1462_v22 = vsel %vm898_vm13, %v1452_v6, 0.0 }
 0x8f2   : > { %v1461_v18 = vadd.f32 %v1460_v31, %v1459_v5  ;;  %v2364_v50 = vpop.eup %2363  ;;  %v1455_v37 = vmul.f32 %v2362_v49, %v2975_v56  ;;  %v1464_v53 = vsel %vm898_vm13, %v1453_v45, 0.0 }
 0x8f3   : > { %v1456_v60 = vmul.f32 %v2364_v50, %v2977_v57  ;;  %v1466_v19 = vsel %vm898_vm13, %v1454_v51, 0.0  ;;  %v2327_v51 = vld [vmem:[#allocation9 + $0x60] sm:$0xff]  }
 0x8f4   : > { %v1463_v58 = vadd.f32 %v1462_v22, %v1461_v18  ;;  %v1468_v61 = vsel %vm898_vm13, %v1455_v37, 0.0  ;;  %v2324_v18 = vld [vmem:[#allocation9 + $0x48] sm:$0xff]  }
 0x8f5   : > { %v1470_v20 = vsel %vm898_vm13, %v1456_v60, 0.0  ;;  %v2328_v22 = vld [vmem:[#allocation9 + $0x68] sm:$0xff]  }
 0x8f6   : > { %v1465_v11 = vadd.f32 %v1464_v53, %v1463_v58  ;;  %v2330_v58 = vld [vmem:[#allocation9 + $0x78] sm:$0xff]  }
 0x8f8   : > { %v1467_v54 = vadd.f32 %v1466_v19, %v1465_v11 }
 0x8fa   : > { %v1469_v17 = vadd.f32 %v1468_v61, %v1467_v54  ;;  %v1953_v54 = vld [vmem:[%s3352_s6 + $0x1] ss:$0 sm:$0xff] }
 0x8fc   : > { %v1471_v55 = vadd.f32 %v1470_v20, %v1469_v17 }
 0x8fe   : > { %1472 = vadd.xlane.f32.xlu0 %v1471_v55 }
 0x98b   : > { %v1473_v43 = vpop.xlane.xlu0 %1472 }
 0x98c   : > { %v1474_v16 = vrot.slane %v1473_v43, 4 }
 0x98e   : > { %v1475_v8 = vadd.f32 %v1474_v16, %v1473_v43 }
 0x990   : > { %v1476_v29 = vrot.slane %v1475_v8, 2 }
 0x992   : > { %v1477_v56 = vadd.f32 %v1476_v29, %v1475_v8 }
 0x994   : > { %v1478_v14 = vrot.slane %v1477_v56, 1 }
 0x996   : > { %v1479_v38 = vadd.f32 %v1478_v14, %v1477_v56 }
 0x998   : > { %2204 = vpush %v1479_v38 }
 0x9c9   : > { %s2205_s28 = spop %2204 }
 0x9ca   : > { %v1481_v57 = vstv %s2205_s28 }
 0x9cb   : > { %2365 = vrcp.f32 %v1481_v57  ;;  %vm1482_vm1 = vcmp.gt.f32.partialorder %v1481_v57, 0.0 }
 0x9d5   : > { %v2366_v25 = vpop.eup %2365 }
 0x9d6   : > { %v1484_v28 = vsel %vm1482_vm1, %v2366_v25, 0.0 }
 0x9d7   : > { %v3221_v12 = vmul.f32 %v2350_v26, %v1484_v28  ;;  %v3223_v41 = vmul.f32 %v2352_v59, %v1484_v28  ;;  %v3225_v39 = vmul.f32 %v2354_v7, %v1484_v28  ;;  %v3227_v6 = vmul.f32 %v2356_v2, %v1484_v28 }
 0x9d8   : > { %v3229_v0 = vmul.f32 %v2358_v42, %v1484_v28  ;;  %v3231_v5 = vmul.f32 %v2360_v3, %v1484_v28  ;;  %v3245_v2 = vmul.f32 %v2362_v49, %v1484_v28  ;;  %v3253_v1 = vmul.f32 %v2364_v50, %v1484_v28  ;;  %v2329_v50 = vld [vmem:[#allocation9 + $0x70] sm:$0xff]  }
 0x9d9   : > { %v1493_v45 = vmul.f32 %v3221_v12, %v1368_v4  ;;  %v1494_v31 = vmul.f32 %v3223_v41, %v1369_v48  ;;  %v1495_v26 = vmul.f32 %v3225_v39, %v1370_v15  ;;  %v1496_v59 = vmul.f32 %v3227_v6, %v1371_v44 }
 0x9da   : > { %v1497_v4 = vmul.f32 %v3229_v0, %v3399_v30  ;;  %v1498_v48 = vmul.f32 %v3231_v5, %v3400_v47  ;;  %v1499_v44 = vmul.f32 %v3245_v2, %v3401_v63  ;;  %v3402_v3 = vmax.f32 %v3176_v9, 0.0  ;;  %v2326_v9 = vld [vmem:[#allocation9 + $0x58] sm:$0xff]  }
 0x9db   : > { %v1501_v7 = vpack.c.bf16 %v1494_v31, %v1493_v45  ;;  %v1502_v42 = vpack.c.bf16 %v1496_v59, %v1495_v26 }
 0x9dc   : > { %v1503_v15 = vpack.c.bf16 %v1498_v48, %v1497_v4  ;;  %v1500_v49 = vmul.f32 %v3253_v1, %v3402_v3 }
 0x9dd   : > { %2150 = vmatprep.subr.bf16.mxu1 %v1501_v7 }
 0x9de   : > { %2151 = vmatpush3.bf16.msra.mxu1 %v1501_v7  ;;  %v1504_v34 = vpack.c.bf16 %v1500_v49, %v1499_v44 }
 0x9df   : > { %2152 = vmatprep.subr.bf16.mxu1 %v1502_v42 }
 0x9e2   : > { %2153 = vmatpush3.bf16.msra.mxu1 %v1502_v42 }
 0x9e3   : > { %2154 = vmatprep.subr.bf16.mxu1 %v1503_v15 }
 0x9e6   : > { %2155 = vmatpush3.bf16.msra.mxu1 %v1503_v15 }
 0x9e7   : > { %2156 = vmatprep.subr.bf16.mxu1 %v1504_v34 }
 0x9ea   : > { %2157 = vmatpush3.bf16.msra.mxu1 %v1504_v34 }
 0x9eb   : > { %2162 = vmatprep.subr.bf16.mxu1 %v2323_v40 }
 0x9ed   : > { %2159 = vmatmul.mubr.msk.bf16.vlgmr.msra.gmra.mrb[8].mxu1 %vm947_vm14, %v3063_v32 }
 0x9ee   : > { %2163 = vmatpush3.bf16.msra.mxu1 %v2323_v40 }
 0x9ef   : > { %2164 = vmatprep.subr.bf16.mxu1 %v2324_v18 }
 0x9f2   : > { %2165 = vmatpush3.bf16.msra.mxu1 %v2324_v18 }
 0x9f3   : > { %2166 = vmatprep.subr.bf16.mxu1 %v2325_v52 }
 0x9f6   : > { %2167 = vmatpush3.bf16.msra.mxu1 %v2325_v52 }
 0x9f7   : > { %2168 = vmatprep.subr.bf16.mxu1 %v2326_v9 }
 0x9fa   : > { %2169 = vmatpush3.bf16.msra.mxu1 %v2326_v9 }
 0x9fb   : > { %2170 = vmatprep.subr.bf16.mxu1 %v2327_v51 }
 0x9fe   : > { %2171 = vmatpush3.bf16.msra.mxu1 %v2327_v51 }
 0x9ff   : > { %2172 = vmatprep.subr.bf16.mxu1 %v2328_v22 }
 0xa02   : > { %2173 = vmatpush3.bf16.msra.mxu1 %v2328_v22 }
 0xa03   : > { %2174 = vmatprep.subr.bf16.mxu1 %v2329_v50 }
 0xa06   : > { %2175 = vmatpush3.bf16.msra.mxu1 %v2329_v50 }
 0xa07   : > { %2176 = vmatprep.subr.bf16.mxu1 %v2330_v58 }
 0xa0a   : > { %2177 = vmatpush3.bf16.msra.mxu1 %v2330_v58 }
 0xac0   : > { %v2160_v32 = vpop.f32.mrb[8].mxu1 }
 0xac1   : > { %v1539_v37 = vpop.f32.mrb[9].mxu1 }
 0xac2   : > { %v2161_v53 = vpop.f32.mrb[10].mxu1 }
 0xac3   : > { %v1555_v11 = vpack.c.bf16 %v2161_v53, %v2160_v32  ;;  %v1542_v60 = vpop.f32.mrb[11].mxu1 }
 0xac4   : > { %v1554_v19 = vpack.c.bf16 %v1542_v60, %v1539_v37 }
 0xac6   : > { %2178 = vmatprep.mubr.bf16.mxu1 %v1554_v19 }
 0xac7   : > { %2179 = vmatmul.mubr.bf16.vlgmr.msra.gmra.mrb[12].mxu1 %v1555_v11 }
 0xb9a   : > { %v2180_v61 = vpop.f32.mrb[12].mxu1 }
 0xb9b   : > { %v1653_v17 = vadd.f32 %v2180_v61, %v1953_v54  ;;  %v1644_v20 = vpop.f32.mrb[13].mxu1 }
 0xb9c   : > { %v1645_v55 = vadd.f32 %v1953_v54, %v1644_v20  ;;  %v2181_v43 = vpop.f32.mrb[14].mxu1 }
 0xb9d   : > { %v1661_v16 = vmax.f32 %v1653_v17, 0.0  ;;  %v1656_v8 = vadd.f32 %v2181_v43, %v1953_v54  ;;  %v1647_v29 = vpop.f32.mrb[15].mxu1 }
 0xb9e   : > { %v1659_v56 = vmax.f32 %v1645_v55, 0.0  ;;  %v1648_v14 = vadd.f32 %v1953_v54, %v1647_v29 }
 0xb9f   : > { %1756 = vst [vmem:[#allocation12 + $0x10] sm:$0xff] %v1661_v16  ;;  %v1662_v38 = vmax.f32 %v1656_v8, 0.0 }
 0xba0   : > { %1754 = vst [vmem:[#allocation12] sm:$0xff] %v1659_v56  ;;  %v1660_v57 = vmax.f32 %v1648_v14, 0.0 }
 0xba1   : > { %v1664_v25 = vpack.c.bf16 %v1662_v38, %v1661_v16  ;;  %1757 = vst [vmem:[#allocation12 + $0x18] sm:$0xff] %v1662_v38 }
 0xba2   : > { %v1663_v28 = vpack.c.bf16 %v1660_v57, %v1659_v56  ;;  %1755 = vst [vmem:[#allocation12 + $0x8] sm:$0xff] %v1660_v57 }
 0xba4   : > { %2182 = vmatprep.subr.bf16.mxu0 %v1663_v28 }
 0xba5   : > { %2183 = vmatpush3.bf16.msra.mxu0 %v1663_v28 }
 0xba6   : > { %2184 = vmatprep.subr.bf16.mxu0 %v1664_v25 }
 0xba9   : > { %2185 = vmatpush3.bf16.msra.mxu0 %v1664_v25 }
 0xbac   : > { %2187 = vmatmul.mubr.msk.bf16.vlgmr.msra.gmra.mrb[24].mxu0 %vm546_vm2, %v3080_v10 }
 0xbad   : > { %2190 = vmatprep.mubr.msk.bf16.mxu0 %vm546_vm2, %v3084_v35 }
 0xbb4   : > { %2191 = vmatmul.mubr.msk.bf16.gmra.mrb[28].mxu0 %vm546_vm2, %v3092_v46 }
 0xc7f   : > { %v2188_v45 = vpop.f32.mrb[24].mxu0 }
 0xc80   : > { %v1732_v31 = vmul.f32 %v2188_v45, %v3225_v39  ;;  %v1699_v26 = vpop.f32.mrb[25].mxu0 }
 0xc81   : > { %v1730_v59 = vmul.f32 %v1699_v26, %v3221_v12  ;;  %v2189_v7 = vpop.f32.mrb[26].mxu0 }
 0xc82   : > { %v1740_v42 = vadd.f32 %v1732_v31, %v3110_v23  ;;  %v1733_v30 = vmul.f32 %v2189_v7, %v3227_v6  ;;  %v1702_v4 = vpop.f32.mrb[27].mxu0 }
 0xc83   : > { %v1738_v10 = vadd.f32 %v1730_v59, %v3104_v33  ;;  %v1731_v47 = vmul.f32 %v1702_v4, %v3223_v41 }
 0xc84   : > { %1748 = vst [vmem:[#allocation11 + $0x10] sm:$0xff] %v1740_v42  ;;  %v1741_v35 = vadd.f32 %v1733_v30, %v3101_v36 }
 0xc85   : > { %1746 = vst [vmem:[#allocation11] sm:$0xff] %v1738_v10  ;;  %v1739_v46 = vadd.f32 %v1731_v47, %v3107_v62 }
 0xc86   : > { %1749 = vst [vmem:[#allocation11 + $0x18] sm:$0xff] %v1741_v35 }
 0xc87   : > { %1747 = vst [vmem:[#allocation11 + $0x8] sm:$0xff] %v1739_v46  ;;  %v2192_v39 = vpop.f32.mrb[28].mxu0 }
 0xc88   : > { %v1736_v12 = vmul.f32 %v2192_v39, %v3245_v2  ;;  %v1715_v48 = vpop.f32.mrb[29].mxu0 }
 0xc89   : > { %v1734_v23 = vmul.f32 %v1715_v48, %v3229_v0  ;;  %v2193_v6 = vpop.f32.mrb[30].mxu0 }
 0xc8a   : > { %v1744_v15 = vadd.f32 %v1736_v12, %v3130_v27  ;;  %v1737_v33 = vmul.f32 %v2193_v6, %v3253_v1  ;;  %v1718_v41 = vpop.f32.mrb[31].mxu0 }
 0xc8b   : > { %v1742_v63 = vadd.f32 %v1734_v23, %v3124_v13  ;;  %v1735_v36 = vmul.f32 %v1718_v41, %v3231_v5 }
 0xc8c   : > { %1752 = vst [vmem:[#allocation11 + $0x30] sm:$0xff] %v1744_v15  ;;  %v1745_v62 = vadd.f32 %v1737_v33, %v3121_v24 }
 0xc8d   : > { %1750 = vst [vmem:[#allocation11 + $0x20] sm:$0xff] %v1742_v63  ;;  %v1743_v44 = vadd.f32 %v1735_v36, %v3127_v21 }
 0xc8e   : > { %1753 = vst [vmem:[#allocation11 + $0x38] sm:$0xff] %v1745_v62 }
 0xc8f   : > { %1751 = vst [vmem:[#allocation11 + $0x28] sm:$0xff] %v1743_v44 }
 0xc90 PF: > { %p2249_p5 = scmp.eq.s32.totalorder %s2668_s13, 1  ;;  %s2595_s15 = smov [#allocation11]  }
 0xc91   : > { %s1764_s27 = sshll.u32 %s2595_s15, 4  ;;  %s1765_s27 = int_to_ptr.vmem [resolvable:$true] %s1764_s27 }
 0xc92   : > { %s2481_s17 = scalar_lea.vmem %s1765_s27, 1024  ;;  %p2488_p2 = scmp.lt.s32.totalorder %s1765_s27, %s1765_s27 }
 0xc93   : > { %p2482_p6 = scmp.ne.s32.totalorder %s1765_s27, %s2481_s17  ;;  %p2489_p13 = scmp.lt.s32.totalorder %s2481_s17, %s2481_s17 }
 0xc95   : > { %p2483_p12 = pnand %p2482_p6, %p2249_p5  ;;  %p2490_p11 = por %p2489_p13, %p2488_p2 }
 0xc97   : > { %p2484_p0 = pneg %p2483_p12 }
 0xc99   : > { %p2491_p3 = pnand %p2490_p11, %p2484_p0 }
 0xc9b   : > { %2494 = shalt.err (!%p2491_p3)
}
 0xc9c   : > { %s2495_s12 = scalar_lea.hbm %s3354_s8, 1024 }
 0xc9d   : > { %p2496_p7 = scmp.ne.s32.totalorder %s3354_s8, %s2495_s12  ;;  %p2501_p9 = scmp.lt.u32.totalorder %s2495_s12, %s3354_s8 }
 0xc9f   : > { %p2497_p8 = pnand %p2496_p7, %p2249_p5 }
 0xca1   : > { %p2498_p10 = pneg %p2497_p8 }
 0xca3   : > { %p2503_p1 = pnand %p2501_p9, %p2498_p10 }
 0xca5   : > { %2506 = shalt.err (!%p2503_p1)
}
 0xca6   : > { %s2596_s2 = smov 128   ;;  %s2597_s9 = smov 8  }
 0xca7   : > { %2221 = dma.vmem_to_hbm [thread:$0]  (%p2249_p5), %s1765_s27, 1024, %s3354_s8, [#allocation5], %s2596_s2, %s2596_s2, %s2597_s9  }
 0xca8   : > { %s2598_s25 = smov [#allocation12]  }
 0xca9   : > { %s1777_s28 = sshll.u32 %s2598_s25, 4  ;;  %s1778_s28 = int_to_ptr.vmem [resolvable:$true] %s1777_s28 }
 0xcaa   : > { %s2507_s29 = scalar_lea.vmem %s1778_s28, 512  ;;  %p2514_p0 = scmp.lt.s32.totalorder %s1778_s28, %s1778_s28 }
 0xcab   : > { %p2508_p4 = scmp.ne.s32.totalorder %s1778_s28, %s2507_s29  ;;  %p2515_p2 = scmp.lt.s32.totalorder %s2507_s29, %s2507_s29 }
 0xcad   : > { %p2509_p6 = pnand %p2508_p4, %p2249_p5  ;;  %p2516_p13 = por %p2515_p2, %p2514_p0 }
 0xcaf   : > { %p2510_p12 = pneg %p2509_p6 }
 0xcb1   : > { %p2517_p11 = pnand %p2516_p13, %p2510_p12 }
 0xcb3   : > { %2520 = shalt.err (!%p2517_p11)
}
 0xcb4   : > { %s3403_s17 = sld [smem:[#allocation21_spill]] }
 0xcba   : > { %s2521_s14 = scalar_lea.hbm %s3403_s17, 512 }
 0xcbb   : > { %p2522_p3 = scmp.ne.s32.totalorder %s3403_s17, %s2521_s14  ;;  %p2527_p10 = scmp.lt.u32.totalorder %s2521_s14, %s3403_s17 }
 0xcbd   : > { %p2523_p7 = pnand %p2522_p3, %p2249_p5 }
 0xcbf   : > { %p2524_p8 = pneg %p2523_p7 }
 0xcc1   : > { %p2529_p9 = pnand %p2527_p10, %p2524_p8 }
 0xcc3   : > { %2532 = shalt.err (!%p2529_p9)
}
 0xcc4   : > { %2223 = dma.vmem_to_hbm [thread:$0]  (%p2249_p5), %s1778_s28, 512, %s3403_s17, [#allocation13], %s2596_s2, %s2596_s2, %s2597_s9  }
 0xcc5   : > { %2562 = dma.done.wait (%p2249_p5), [#allocation5], 1024  }
 0xcc6   : > { %2564 = vsyncadd (%p2249_p5), [#allocation5], 4294966272 }
 0xcc7   : > { %2566 = dma.done.wait (%p2249_p5), [#allocation13], 512  }
 0xcc8   : > { %2568 = vsyncadd (%p2249_p5), [#allocation13], 4294966784 }
 0xcc9 PF: > { %p24_p1 = scmp.ge.s32.totalorder %s2743_s24, 4   ;;  %s3404_s30 = smov %s2575_s10 }
 0xcca   : > { %s3405_s10 = smov %s2579_s11  ;;  %s3406_s11 = smov %s2771_s18 }
 0xccb   : > { %s3407_s12 = smov %s2743_s24  ;;  %26 = sbr.rel (!%p24_p1) target bundleno = 10 (0xa), region = 124 }
 0xcd2   :  { %1797 = vsyncpa [#allocation4], 1 }
 0xcd3   :  { %1799 = vsyncpa [#allocation4 + $0x1], 1 }
 0xcd4   :  { %1800 = vsyncpa [#allocation7], 1 }
 0xcd5   :  { %1801 = vsyncpa [#allocation10], 1 }
 0xcd6   :  { %1802 = vsyncpa [#allocation5], 1 }
 0xcd7   :  { %1804 = vsyncpa [#allocation5 + $0x1], 1 }
 0xcd8   :  { %1805 = vsyncpa [#allocation13], 1 }

</bundles_post_ra>
